<compile_context>
chip_gen: v7x
topology: tpu7x:2x2x1
jax: 0.10.0
libtpu: 0.0.40
codegen_flags: <defaults>
</compile_context>

<pallas_src>
import functools

import jax
import jax.numpy as jnp
from jax.experimental import pallas as pl
from jax.experimental.pallas import tpu as pltpu

LANE = 128
SUBLANE = 8


def _round_up(n, m):
    return ((n + m - 1) // m) * m


def _make_aux_kernel(num_hidden_blocks):
    """Kernel factory: refs = (x, w0, b0, [w_h, b_h]*num_hidden_blocks, w_out, b_out, o)."""

    def kernel(*refs):
        x_ref = refs[0]
        o_ref = refs[-1]
        wb = refs[1:-1]

        # Layer 0: Linear(input_dim, hidden_dim) + ReLU  (f32 accumulation on the MXU).
        h = jnp.dot(x_ref[...], wb[0][...], preferred_element_type=jnp.float32) + wb[1][...]
        h = jnp.maximum(h, 0.0)

        # Hidden blocks: Linear + ReLU (+ Dropout == identity in eval / p = 0).
        idx = 2
        for _ in range(num_hidden_blocks):
            w = wb[idx][...]
            h = jnp.dot(h.astype(w.dtype), w, preferred_element_type=jnp.float32) + wb[idx + 1][...]
            h = jnp.maximum(h, 0.0)
            idx += 2

        # Output layer: Linear(hidden_dim, output_dim), no activation. Narrow (bb, out_dim)
        # store -> 4 B/row writeback instead of a 128-lane padded slab.
        w = wb[idx][...]
        o_ref[...] = (
            jnp.dot(h.astype(w.dtype), w, preferred_element_type=jnp.float32) + wb[idx + 1][...]
        ).astype(o_ref.dtype)

    return kernel


def prepare_aux_params(params, dtype=jnp.float32):
    """One-time padding / casting of the AuxTaskNN parameters (hoisted out of forward).

    Args:
      params: list of (w, b) in application order; w: (in_dim, out_dim), b: (out_dim,).
              (Weights are transposed vs. PyTorch so the kernel computes x @ W + b.)
      dtype:  operand dtype for x / weights. jnp.bfloat16 recommended on v6e/v7x (halves
              HBM traffic and resident VMEM); keep jnp.float32 on v5e. Biases and all
              elementwise math stay f32; matmuls accumulate in f32 either way.
    """
    in_dim = params[0][0].shape[0]
    out_dim = params[-1][0].shape[1]
    # Hidden dims -> lane-dense (multiple of 128); input dim -> sublane-aligned
    # (multiple of 8, usually a no-op); output dim left unpadded.
    dims_p = (
        [_round_up(in_dim, SUBLANE)]
        + [_round_up(w.shape[1], LANE) for w, _ in params[:-1]]
        + [out_dim]
    )
    flat = []
    for i, (w, b) in enumerate(params):
        wp = jnp.pad(
            w.astype(jnp.float32),
            ((0, dims_p[i] - w.shape[0]), (0, dims_p[i + 1] - w.shape[1])),
        ).astype(dtype)
        bp = jnp.pad(
            b.reshape(1, -1).astype(jnp.float32),
            ((0, 0), (0, dims_p[i + 1] - w.shape[1])),
        )
        flat += [wp, bp]
    return dict(
        flat=tuple(flat),
        in_dim=in_dim,
        in_dim_p=dims_p[0],
        out_dim=out_dim,
        n_hidden=len(params) - 2,
        dtype=dtype,
    )


def _choose_block_b(batch, requested):
    bb = max(SUBLANE, _round_up(min(requested, batch), SUBLANE))
    # Keep the batch grid >= 2 steps whenever the batch allows it: enables DMA
    # pipelining on all chips and lets the "parallel" batch axis occupy both
    # TensorCores on v7x.
    if batch > SUBLANE and pl.cdiv(batch, bb) < 2:
        bb = max(SUBLANE, _round_up(pl.cdiv(batch, 2), SUBLANE))
    return bb, _round_up(batch, bb)


def aux_task_nn_forward(x, prepared, *, block_b=512):
    """Fused AuxTaskNN forward pass (eval mode) over pre-padded parameters."""
    B, Din = x.shape
    assert Din == prepared["in_dim"]
    in_p = prepared["in_dim_p"]
    out_dim = prepared["out_dim"]
    flat = prepared["flat"]
    dtype = prepared["dtype"]

    bb, Bp = _choose_block_b(B, block_b)

    xp = x.astype(dtype) if x.dtype != dtype else x
    if Bp != B or in_p != Din:
        xp = jnp.pad(xp, ((0, Bp - B), (0, in_p - Din)))

    grid = (Bp // bb,)

    # Weights/biases: constant index_map -> one DMA, then VMEM-resident for all steps.
    resident = lambda a: pl.BlockSpec(a.shape, lambda i: (0, 0))

    out = pl.pallas_call(
        _make_aux_kernel(prepared["n_hidden"]),
        out_shape=jax.ShapeDtypeStruct((Bp, out_dim), jnp.float32),
        grid=grid,
        in_specs=[pl.BlockSpec((bb, in_p), lambda i: (i, 0))]
        + [resident(a) for a in flat],
        out_specs=pl.BlockSpec((bb, out_dim), lambda i: (i, 0)),
        compiler_params=pltpu.CompilerParams(
            dimension_semantics=("parallel",),
        ),
    )(xp, *flat)

    return out if Bp == B else out[:B]


def _init_linear(key, in_dim, out_dim):
    # Deterministic init, roughly matching PyTorch's U(-1/sqrt(in), 1/sqrt(in)).
    kw, kb = jax.random.split(key)
    bound = 1.0 / jnp.sqrt(jnp.float32(in_dim))
    w = jax.random.uniform(kw, (in_dim, out_dim), jnp.float32, -bound, bound)
    b = jax.random.uniform(kb, (out_dim,), jnp.float32, -bound, bound)
    return w, b


def _reference(x, params):
    w, b = params[0]
    h = jnp.maximum(x @ w + b, 0.0)
    for w, b in params[1:-1]:
        h = jnp.maximum(h @ w + b, 0.0)  # Dropout(p=0) == identity
    w, b = params[-1]
    return h @ w + b


if __name__ == "__main__":
    # AuxTaskNN(input_dim=16, hidden_dim=32, num_layers=2, dropout=0.0, output_dim=1)
    # batch=1024 so block_b=512 gives a 2-step batch grid (pipelined; both v7x TCs).
    batch, input_dim, hidden_dim, output_dim, num_layers = 1024, 16, 32, 1, 2

    key = jax.random.PRNGKey(0)
    keys = jax.random.split(key, num_layers + 2)
    kx, layer_keys = keys[0], keys[1:]

    x = jax.random.normal(kx, (batch, input_dim), jnp.float32)

    dims = [input_dim] + [hidden_dim] * num_layers + [output_dim]
    params = [
        _init_linear(layer_keys[i], dims[i], dims[i + 1]) for i in range(num_layers + 1)
    ]

    # One-time parameter prep (padding / flattening) hoisted out of the forward call.
    prepared = prepare_aux_params(params, dtype=jnp.float32)

    fwd = jax.jit(functools.partial(aux_task_nn_forward, prepared=prepared, block_b=512))
    out = jax.block_until_ready(fwd(x))

    # Pure-JAX reference check.
    ref = _reference(x, params)
    assert out.shape == (batch, output_dim)
    assert jnp.allclose(out, ref, atol=1e-4, rtol=1e-4)

    print("KERNEL_OK")
</pallas_src>

<mosaic_0001>
module attributes {stable_mosaic.version = 11 : i64} {
  func.func @kernel(%arg0: i32, %arg1: memref<512x16xf32, #tpu.memory_space<vmem>>, %arg2: memref<16x128xf32, #tpu.memory_space<vmem>>, %arg3: memref<1x128xf32, #tpu.memory_space<vmem>>, %arg4: memref<128x128xf32, #tpu.memory_space<vmem>>, %arg5: memref<1x128xf32, #tpu.memory_space<vmem>>, %arg6: memref<128x1xf32, #tpu.memory_space<vmem>>, %arg7: memref<1x1xf32, #tpu.memory_space<vmem>>, %arg8: memref<512x1xf32, #tpu.memory_space<vmem>>) attributes {dimension_semantics = [#tpu.dimension_semantics<parallel>], iteration_bounds = array<i64: 2>, scalar_prefetch = 0 : i64, scratch_operands = 0 : i64, tpu.core_type = #tpu.core_type<tc>, window_params = [{transform_indices = @transform_0, window_bounds = array<i64: 512, 16>}, {pipeline_mode = #tpu.pipeline_mode<synchronous>, transform_indices = @transform_1, window_bounds = array<i64: 16, 128>}, {pipeline_mode = #tpu.pipeline_mode<synchronous>, transform_indices = @transform_2, window_bounds = array<i64: 1, 128>}, {pipeline_mode = #tpu.pipeline_mode<synchronous>, transform_indices = @transform_3, window_bounds = array<i64: 128, 128>}, {pipeline_mode = #tpu.pipeline_mode<synchronous>, transform_indices = @transform_4, window_bounds = array<i64: 1, 128>}, {pipeline_mode = #tpu.pipeline_mode<synchronous>, transform_indices = @transform_5, window_bounds = array<i64: 128, 1>}, {pipeline_mode = #tpu.pipeline_mode<synchronous>, transform_indices = @transform_6, window_bounds = array<i64: 1, 1>}, {transform_indices = @transform_7, window_bounds = array<i64: 512, 1>}]} {
    %c0 = arith.constant 0 : index
    %c0_0 = arith.constant 0 : index
    %0 = vector.load %arg1[%c0, %c0_0] : memref<512x16xf32, #tpu.memory_space<vmem>>, vector<512x16xf32>
    %c0_1 = arith.constant 0 : index
    %c0_2 = arith.constant 0 : index
    %1 = vector.load %arg2[%c0_1, %c0_2] : memref<16x128xf32, #tpu.memory_space<vmem>>, vector<16x128xf32>
    %cst = arith.constant dense<0.000000e+00> : vector<512x128xf32>
    %2 = tpu.matmul %0, %1, %cst {dimension_numbers = #tpu.dot_dimension_numbers<[1], [0], [0], [1], [0, 0, 1, 1], [], []>} : vector<512x16xf32>, vector<16x128xf32>, vector<512x128xf32> -> vector<512x128xf32>
    %c0_3 = arith.constant 0 : index
    %c0_4 = arith.constant 0 : index
    %3 = vector.load %arg3[%c0_3, %c0_4] : memref<1x128xf32, #tpu.memory_space<vmem>>, vector<1x128xf32>
    %4 = vector.broadcast %3 : vector<1x128xf32> to vector<512x128xf32>
    %5 = arith.addf %2, %4 : vector<512x128xf32>
    %cst_5 = arith.constant 0.000000e+00 : f32
    %6 = vector.broadcast %cst_5 : f32 to vector<512x128xf32>
    %7 = arith.maximumf %5, %6 : vector<512x128xf32>
    %c0_6 = arith.constant 0 : index
    %c0_7 = arith.constant 0 : index
    %8 = vector.load %arg4[%c0_6, %c0_7] : memref<128x128xf32, #tpu.memory_space<vmem>>, vector<128x128xf32>
    %cst_8 = arith.constant dense<0.000000e+00> : vector<512x128xf32>
    %9 = tpu.matmul %7, %8, %cst_8 {dimension_numbers = #tpu.dot_dimension_numbers<[1], [0], [0], [1], [0, 0, 1, 1], [], []>} : vector<512x128xf32>, vector<128x128xf32>, vector<512x128xf32> -> vector<512x128xf32>
    %c0_9 = arith.constant 0 : index
    %c0_10 = arith.constant 0 : index
    %10 = vector.load %arg5[%c0_9, %c0_10] : memref<1x128xf32, #tpu.memory_space<vmem>>, vector<1x128xf32>
    %11 = vector.broadcast %10 : vector<1x128xf32> to vector<512x128xf32>
    %12 = arith.addf %9, %11 : vector<512x128xf32>
    %cst_11 = arith.constant 0.000000e+00 : f32
    %13 = vector.broadcast %cst_11 : f32 to vector<512x128xf32>
    %14 = arith.maximumf %12, %13 : vector<512x128xf32>
    %c0_12 = arith.constant 0 : index
    %c0_13 = arith.constant 0 : index
    %15 = vector.load %arg6[%c0_12, %c0_13] : memref<128x1xf32, #tpu.memory_space<vmem>>, vector<128x1xf32>
    %cst_14 = arith.constant dense<0.000000e+00> : vector<512x1xf32>
    %16 = tpu.matmul %14, %15, %cst_14 {dimension_numbers = #tpu.dot_dimension_numbers<[1], [0], [0], [1], [0, 0, 1, 1], [], []>} : vector<512x128xf32>, vector<128x1xf32>, vector<512x1xf32> -> vector<512x1xf32>
    %c0_15 = arith.constant 0 : index
    %c0_16 = arith.constant 0 : index
    %17 = vector.load %arg7[%c0_15, %c0_16] : memref<1x1xf32, #tpu.memory_space<vmem>>, vector<1x1xf32>
    %18 = vector.broadcast %17 : vector<1x1xf32> to vector<512x1xf32>
    %19 = arith.addf %16, %18 : vector<512x1xf32>
    %c0_17 = arith.constant 0 : index
    %c0_18 = arith.constant 0 : index
    %20 = vector.load %arg8[%c0_17, %c0_18] : memref<512x1xf32, #tpu.memory_space<vmem>>, vector<512x1xf32>
    tpu.vector_store %arg8[%c0_17, %c0_18], %19 {strides = array<i32>} : memref<512x1xf32, #tpu.memory_space<vmem>>, vector<512x1xf32>,
    return
  }
  func.func @transform_0(%arg0: i32) -> (i32, i32) {
    %c0_i32 = arith.constant 0 : i32
    %c0_i32_0 = arith.constant 0 : i32
    return %arg0, %c0_i32 : i32, i32
  }
  func.func @transform_1(%arg0: i32) -> (i32, i32) {
    %c0_i32 = arith.constant 0 : i32
    %c0_i32_0 = arith.constant 0 : i32
    %c0_i32_1 = arith.constant 0 : i32
    return %c0_i32, %c0_i32_0 : i32, i32
  }
  func.func @transform_2(%arg0: i32) -> (i32, i32) {
    %c0_i32 = arith.constant 0 : i32
    %c0_i32_0 = arith.constant 0 : i32
    %c0_i32_1 = arith.constant 0 : i32
    return %c0_i32, %c0_i32_0 : i32, i32
  }
  func.func @transform_3(%arg0: i32) -> (i32, i32) {
    %c0_i32 = arith.constant 0 : i32
    %c0_i32_0 = arith.constant 0 : i32
    %c0_i32_1 = arith.constant 0 : i32
    return %c0_i32, %c0_i32_0 : i32, i32
  }
  func.func @transform_4(%arg0: i32) -> (i32, i32) {
    %c0_i32 = arith.constant 0 : i32
    %c0_i32_0 = arith.constant 0 : i32
    %c0_i32_1 = arith.constant 0 : i32
    return %c0_i32, %c0_i32_0 : i32, i32
  }
  func.func @transform_5(%arg0: i32) -> (i32, i32) {
    %c0_i32 = arith.constant 0 : i32
    %c0_i32_0 = arith.constant 0 : i32
    %c0_i32_1 = arith.constant 0 : i32
    return %c0_i32, %c0_i32_0 : i32, i32
  }
  func.func @transform_6(%arg0: i32) -> (i32, i32) {
    %c0_i32 = arith.constant 0 : i32
    %c0_i32_0 = arith.constant 0 : i32
    %c0_i32_1 = arith.constant 0 : i32
    return %c0_i32, %c0_i32_0 : i32, i32
  }
  func.func @transform_7(%arg0: i32) -> (i32, i32) {
    %c0_i32 = arith.constant 0 : i32
    %c0_i32_0 = arith.constant 0 : i32
    return %arg0, %c0_i32 : i32, i32
  }
}

</mosaic_0001>

<bundles_post_ra>
// kernel: aux_task_nn_forward.1
= control target key start
LH: loop header
LB: loop body
LE: loop exit
PB: predicated region body
PF: predicated region fallthrough
CT: control target
= control target key end

     0   :  { %s2789_s26 = smov 0   ;;  %s3475_s0 = inlined_call_operand.vmem [shape: f32[1024,16], index: 0, kind: input, shape index: {}]   ;;  %s3476_s1 = inlined_call_operand.vmem [shape: f32[16,128], index: 1, kind: input, shape index: {}]   ;;  %s3477_s2 = inlined_call_operand.vmem [shape: f32[1,128], index: 2, kind: input, shape index: {}]   ;;  %s3478_s3 = inlined_call_operand.vmem [shape: f32[128,128], index: 3, kind: input, shape index: {}]   ;;  %s3479_s4 = inlined_call_operand.vmem [shape: f32[1,128], index: 4, kind: input, shape index: {}]   ;;  %s3480_s5 = inlined_call_operand.vmem [shape: f32[128,1], index: 5, kind: input, shape index: {}]   ;;  %s3481_s6 = inlined_call_operand.<no memory space> [shape: f32[1,1], index: 6, kind: input, shape index: {}]   ;;  %s3482_s7 = inlined_call_operand.vmem [shape: f32[1024,1], index: 7, kind: output, shape index: {}]  }
   0x1   :  { %v12_v0 = vstv %s3481_s6 }
   0x2   :  { %13 = vst [vmem:[#allocation2] sm:$0x1] %v12_v0 }
   0x3 LB: > { %s2000_s27 = sadd.s32 4294967295, %s2744_s26   ;;  %p2004_p0 = scmp.ge.s32.totalorder %s2744_s26, 1  ;;  %s2744_s26 = sphi %s2789_s26, %s19_s26  }
   0x4   : > { %p240_p1 = scmp.lt.s32.totalorder %s2744_s26, 3 }
   0x6   : > { %p241_p2 = pnand %p2004_p0, %p240_p1 }
   0x7   : > { %v348_v1 = vld [vmem:[%s3476_s1] sm:$0xff] (!%p241_p2)  ;;  %v349_v2 = vld [vmem:[%s3476_s1 + $0x8] sm:$0xff] (!%p241_p2)  ;;  %s2005_s8 = sshll.u32 (!%p241_p2), %s2000_s27, 6  ;;  %vm357_vm0 = vcmask (!%p241_p2), 130048   ;;  %v1001_v13 = vld [vmem:[%s3478_s3 + $0x10] sm:$0xff] (!%p241_p2)  ;;  %vm1879_vm1 = vcmask (!%p241_p2), 7168  }
   0x8   : > { %244 = sbr.rel (%p241_p2) target bundleno = 796 (0x31c), region = 48  ;;  %v999_v3 = vld [vmem:[%s3478_s3] sm:$0xff] (!%p241_p2)  ;;  %v2660_v4 = vpack.c.bf16 (!%p241_p2), %v349_v2, %v348_v1  ;;  %p273_p3 = scmp.lt.s32.totalorder (!%p241_p2), %s2005_s8, 127  ;;  %v1000_v5 = vld [vmem:[%s3478_s3 + $0x8] sm:$0xff] (!%p241_p2)  ;;  %v1002_v14 = vld [vmem:[%s3478_s3 + $0x18] sm:$0xff] (!%p241_p2) }
   0x9   : > { %v2664_v6 = vpack.c.bf16 (!%p241_p2), %v1000_v5, %v999_v3  ;;  %v2668_v17 = vpack.c.bf16 (!%p241_p2), %v1002_v14, %v1001_v13  ;;  %v1003_v18 = vld [vmem:[%s3478_s3 + $0x20] sm:$0xff] (!%p241_p2)  ;;  %v1004_v19 = vld [vmem:[%s3478_s3 + $0x28] sm:$0xff] (!%p241_p2)  ;;  %v1005_v28 = vld [vmem:[%s3478_s3 + $0x30] sm:$0xff] (!%p241_p2) }
   0xa   : > { %2661 = vmatprep.subr.bf16.mxu0 (!%p241_p2), %v2660_v4  ;;  %2728 = vmatprep.subr.bf16.mxu1 (!%p241_p2), %v2660_v4  ;;  %v2672_v26 = vpack.c.bf16 (!%p241_p2), %v1004_v19, %v1003_v18  ;;  %v1006_v29 = vld [vmem:[%s3478_s3 + $0x38] sm:$0xff] (!%p241_p2)  ;;  %v1007_v35 = vld [vmem:[%s3478_s3 + $0x40] sm:$0xff] (!%p241_p2)  ;;  %v1008_v36 = vld [vmem:[%s3478_s3 + $0x48] sm:$0xff] (!%p241_p2) }
   0xb   : > { %2663 = vmatpush3.bf16.msra.mxu0 (!%p241_p2), %v2660_v4  ;;  %2729 = vmatpush3.bf16.msra.mxu1 (!%p241_p2), %v2660_v4  ;;  %v2676_v33 = vpack.c.bf16 (!%p241_p2), %v1006_v29, %v1005_v28  ;;  %v2680_v40 = vpack.c.bf16 (!%p241_p2), %v1008_v36, %v1007_v35  ;;  %v1009_v42 = vld [vmem:[%s3478_s3 + $0x50] sm:$0xff] (!%p241_p2)  ;;  %v1010_v43 = vld [vmem:[%s3478_s3 + $0x58] sm:$0xff] (!%p241_p2)  ;;  %v1011_v49 = vld [vmem:[%s3478_s3 + $0x60] sm:$0xff] (!%p241_p2) }
   0xc   : > { %2665 = vmatprep.subr.bf16.mxu1 (!%p241_p2), %v2664_v6  ;;  %v2684_v47 = vpack.c.bf16 (!%p241_p2), %v1010_v43, %v1009_v42  ;;  %v1012_v50 = vld [vmem:[%s3478_s3 + $0x68] sm:$0xff] (!%p241_p2)  ;;  %v1013_v56 = vld [vmem:[%s3478_s3 + $0x70] sm:$0xff] (!%p241_p2)  ;;  %v1014_v57 = vld [vmem:[%s3478_s3 + $0x78] sm:$0xff] (!%p241_p2) }
   0xd   : > { %v2688_v54 = vpack.c.bf16 (!%p241_p2), %v1012_v50, %v1011_v49  ;;  %v2692_v61 = vpack.c.bf16 (!%p241_p2), %v1014_v57, %v1013_v56  ;;  %v2992_v28 = vld [vmem:[%s3477_s2] ss:$0 sm:$0xff] (!%p241_p2)  ;;  %v1473_v35 = vld [vmem:[%s3480_s5 + $0x10] sm:$0xff] (!%p241_p2) }
   0xf   : > { %s3484_s8 = smov (!%p273_p3, %s2005_s8), 127 }
  0x10   : > { %s2006_s13 = sshll.u32 %s3484_s8, 3 }
  0x11   : > { %s2817_s16 = scalar_lea.vmem %s3475_s0, %s2006_s13  ;;  %s3278_s21 = scalar_lea.vmem %s3482_s7, %s2006_s13 }
  0x12   : > { %v284_v7 = vld [vmem:[%s2817_s16] sm:$0xff]  ;;  %v285_v8 = vld [vmem:[%s2817_s16 + $0x8] sm:$0xff]  ;;  %v286_v9 = vld [vmem:[%s2817_s16 + $0x10] sm:$0xff] }
  0x13   : > { %2308 = vmatprep.mubr.msk.f32.mxu0 %vm357_vm0, %v284_v7  ;;  %v287_v10 = vld [vmem:[%s2817_s16 + $0x18] sm:$0xff]  ;;  %v288_v11 = vld [vmem:[%s2817_s16 + $0x20] sm:$0xff]  ;;  %v289_v12 = vld [vmem:[%s2817_s16 + $0x28] sm:$0xff] }
  0x14   : > { %2309 = vmatmul.mubr.msk.f32.vlgmr.msra.gmra.mrb[0].mxu0 %vm357_vm0, %v285_v8  ;;  %v290_v15 = vld [vmem:[%s2817_s16 + $0x30] sm:$0xff]  ;;  %v316_v16 = vld [vmem:[%s2817_s16 + $0x100] sm:$0xff]  ;;  %v291_v20 = vld [vmem:[%s2817_s16 + $0x38] sm:$0xff] }
  0x15   : > { %2311 = vmatprep.mubr.msk.f32.mxu0 %vm357_vm0, %v286_v9  ;;  %2356 = vmatprep.mubr.msk.f32.mxu1 %vm357_vm0, %v316_v16  ;;  %v317_v21 = vld [vmem:[%s2817_s16 + $0x108] sm:$0xff]  ;;  %v318_v22 = vld [vmem:[%s2817_s16 + $0x110] sm:$0xff]  ;;  %v292_v23 = vld [vmem:[%s2817_s16 + $0x40] sm:$0xff] }
  0x16   : > { %2357 = vmatmul.mubr.msk.f32.vlgmr.msra.gmra.mrb[0].mxu1 %vm357_vm0, %v317_v21  ;;  %v319_v24 = vld [vmem:[%s2817_s16 + $0x118] sm:$0xff]  ;;  %v320_v25 = vld [vmem:[%s2817_s16 + $0x120] sm:$0xff]  ;;  %v293_v27 = vld [vmem:[%s2817_s16 + $0x48] sm:$0xff] }
  0x17   : > { %2359 = vmatprep.mubr.msk.f32.mxu1 %vm357_vm0, %v318_v22  ;;  %2667 = vmatpush3.bf16.msra.mxu1 %v2664_v6  ;;  %v294_v30 = vld [vmem:[%s2817_s16 + $0x50] sm:$0xff]  ;;  %v321_v31 = vld [vmem:[%s2817_s16 + $0x128] sm:$0xff]  ;;  %v295_v34 = vld [vmem:[%s2817_s16 + $0x58] sm:$0xff] }
  0x18   : > { %2312 = vmatmul.mubr.msk.f32.gmra.mrb[2].mxu0 %vm357_vm0, %v287_v10  ;;  %2669 = vmatprep.subr.bf16.mxu1 %v2668_v17  ;;  %v322_v32 = vld [vmem:[%s2817_s16 + $0x130] sm:$0xff]  ;;  %v296_v37 = vld [vmem:[%s2817_s16 + $0x60] sm:$0xff]  ;;  %v323_v38 = vld [vmem:[%s2817_s16 + $0x138] sm:$0xff] }
  0x19   : > { %2314 = vmatprep.mubr.msk.f32.mxu0 %vm357_vm0, %v288_v11  ;;  %v324_v39 = vld [vmem:[%s2817_s16 + $0x140] sm:$0xff]  ;;  %v297_v41 = vld [vmem:[%s2817_s16 + $0x68] sm:$0xff]  ;;  %v298_v44 = vld [vmem:[%s2817_s16 + $0x70] sm:$0xff] }
  0x1a   : > { %2360 = vmatmul.mubr.msk.f32.gmra.mrb[2].mxu1 %vm357_vm0, %v319_v24  ;;  %v325_v45 = vld [vmem:[%s2817_s16 + $0x148] sm:$0xff]  ;;  %v326_v46 = vld [vmem:[%s2817_s16 + $0x150] sm:$0xff]  ;;  %v299_v48 = vld [vmem:[%s2817_s16 + $0x78] sm:$0xff] }
  0x1b   : > { %2362 = vmatprep.mubr.msk.f32.mxu1 %vm357_vm0, %v320_v25  ;;  %2671 = vmatpush3.bf16.msra.mxu1 %v2668_v17  ;;  %v300_v51 = vld [vmem:[%s2817_s16 + $0x80] sm:$0xff]  ;;  %v327_v52 = vld [vmem:[%s2817_s16 + $0x158] sm:$0xff]  ;;  %v301_v55 = vld [vmem:[%s2817_s16 + $0x88] sm:$0xff] }
  0x1c   : > { %2315 = vmatmul.mubr.msk.f32.gmra.mrb[4].mxu0 %vm357_vm0, %v289_v12  ;;  %2673 = vmatprep.subr.bf16.mxu1 %v2672_v26  ;;  %v328_v53 = vld [vmem:[%s2817_s16 + $0x160] sm:$0xff]  ;;  %v302_v58 = vld [vmem:[%s2817_s16 + $0x90] sm:$0xff]  ;;  %v329_v59 = vld [vmem:[%s2817_s16 + $0x168] sm:$0xff] }
  0x1d   : > { %2317 = vmatprep.mubr.msk.f32.mxu0 %vm357_vm0, %v290_v15  ;;  %v330_v60 = vld [vmem:[%s2817_s16 + $0x170] sm:$0xff]  ;;  %v303_v62 = vld [vmem:[%s2817_s16 + $0x98] sm:$0xff]  ;;  %v304_v63 = vld [vmem:[%s2817_s16 + $0xa0] sm:$0xff] }
  0x1e   : > { %2363 = vmatmul.mubr.msk.f32.gmra.mrb[4].mxu1 %vm357_vm0, %v321_v31  ;;  %v331_v0 = vld [vmem:[%s2817_s16 + $0x178] sm:$0xff]  ;;  %v332_v1 = vld [vmem:[%s2817_s16 + $0x180] sm:$0xff]  ;;  %v305_v2 = vld [vmem:[%s2817_s16 + $0xa8] sm:$0xff] }
  0x1f   : > { %2365 = vmatprep.mubr.msk.f32.mxu1 %vm357_vm0, %v322_v32  ;;  %2675 = vmatpush3.bf16.msra.mxu1 %v2672_v26  ;;  %v306_v3 = vld [vmem:[%s2817_s16 + $0xb0] sm:$0xff]  ;;  %v333_v4 = vld [vmem:[%s2817_s16 + $0x188] sm:$0xff]  ;;  %v307_v6 = vld [vmem:[%s2817_s16 + $0xb8] sm:$0xff] }
  0x20   : > { %2318 = vmatmul.mubr.msk.f32.gmra.mrb[6].mxu0 %vm357_vm0, %v291_v20  ;;  %2677 = vmatprep.subr.bf16.mxu1 %v2676_v33  ;;  %v334_v5 = vld [vmem:[%s2817_s16 + $0x190] sm:$0xff]  ;;  %v308_v7 = vld [vmem:[%s2817_s16 + $0xc0] sm:$0xff]  ;;  %v335_v8 = vld [vmem:[%s2817_s16 + $0x198] sm:$0xff] }
  0x21   : > { %2320 = vmatprep.mubr.msk.f32.mxu0 %vm357_vm0, %v292_v23  ;;  %v336_v9 = vld [vmem:[%s2817_s16 + $0x1a0] sm:$0xff]  ;;  %v309_v10 = vld [vmem:[%s2817_s16 + $0xc8] sm:$0xff]  ;;  %v310_v11 = vld [vmem:[%s2817_s16 + $0xd0] sm:$0xff] }
  0x22   : > { %2366 = vmatmul.mubr.msk.f32.gmra.mrb[6].mxu1 %vm357_vm0, %v323_v38  ;;  %v337_v12 = vld [vmem:[%s2817_s16 + $0x1a8] sm:$0xff]  ;;  %v338_v13 = vld [vmem:[%s2817_s16 + $0x1b0] sm:$0xff]  ;;  %v311_v14 = vld [vmem:[%s2817_s16 + $0xd8] sm:$0xff] }
  0x23   : > { %2368 = vmatprep.mubr.msk.f32.mxu1 %vm357_vm0, %v324_v39  ;;  %2679 = vmatpush3.bf16.msra.mxu1 %v2676_v33  ;;  %v312_v15 = vld [vmem:[%s2817_s16 + $0xe0] sm:$0xff]  ;;  %v339_v16 = vld [vmem:[%s2817_s16 + $0x1b8] sm:$0xff]  ;;  %v313_v18 = vld [vmem:[%s2817_s16 + $0xe8] sm:$0xff] }
  0x24   : > { %2321 = vmatmul.mubr.msk.f32.gmra.mrb[8].mxu0 %vm357_vm0, %v293_v27  ;;  %2681 = vmatprep.subr.bf16.mxu1 %v2680_v40  ;;  %v340_v17 = vld [vmem:[%s2817_s16 + $0x1c0] sm:$0xff]  ;;  %v314_v19 = vld [vmem:[%s2817_s16 + $0xf0] sm:$0xff]  ;;  %v341_v20 = vld [vmem:[%s2817_s16 + $0x1c8] sm:$0xff] }
  0x25   : > { %2323 = vmatprep.mubr.msk.f32.mxu0 %vm357_vm0, %v294_v30  ;;  %v342_v21 = vld [vmem:[%s2817_s16 + $0x1d0] sm:$0xff]  ;;  %v315_v22 = vld [vmem:[%s2817_s16 + $0xf8] sm:$0xff]  ;;  %v344_v24 = vld [vmem:[%s2817_s16 + $0x1e0] sm:$0xff] }
  0x26   : > { %2369 = vmatmul.mubr.msk.f32.gmra.mrb[8].mxu1 %vm357_vm0, %v325_v45  ;;  %v343_v23 = vld [vmem:[%s2817_s16 + $0x1d8] sm:$0xff]  ;;  %v345_v25 = vld [vmem:[%s2817_s16 + $0x1e8] sm:$0xff]  ;;  %v346_v26 = vld [vmem:[%s2817_s16 + $0x1f0] sm:$0xff] }
  0x27   : > { %2371 = vmatprep.mubr.msk.f32.mxu1 %vm357_vm0, %v326_v46  ;;  %2683 = vmatpush3.bf16.msra.mxu1 %v2680_v40  ;;  %v347_v27 = vld [vmem:[%s2817_s16 + $0x1f8] sm:$0xff]  ;;  %v1471_v33 = vld [vmem:[%s3480_s5] sm:$0xff]  ;;  %v1476_v45 = vld [vmem:[%s3480_s5 + $0x28] sm:$0xff] }
  0x28   : > { %2324 = vmatmul.mubr.msk.f32.gmra.mrb[10].mxu0 %vm357_vm0, %v295_v34  ;;  %2685 = vmatprep.subr.bf16.mxu1 %v2684_v47  ;;  %v1472_v34 = vld [vmem:[%s3480_s5 + $0x8] sm:$0xff]  ;;  %v1474_v39 = vld [vmem:[%s3480_s5 + $0x18] sm:$0xff] }
  0x29   : > { %2326 = vmatprep.mubr.msk.f32.mxu0 %vm357_vm0, %v296_v37  ;;  %v2696_v38 = vpack.c.bf16 %v1472_v34, %v1471_v33  ;;  %v2700_v43 = vpack.c.bf16 %v1474_v39, %v1473_v35  ;;  %v1485_v34 = vld [vmem:[%s3480_s5 + $0x70] sm:$0xff]  ;;  %v1486_v35 = vld [vmem:[%s3480_s5 + $0x78] sm:$0xff] }
  0x2a   : > { %2372 = vmatmul.mubr.msk.f32.gmra.mrb[10].mxu1 %vm357_vm0, %v327_v52 }
  0x2b   : > { %2374 = vmatprep.mubr.msk.f32.mxu1 %vm357_vm0, %v328_v53  ;;  %2687 = vmatpush3.bf16.msra.mxu1 %v2684_v47  ;;  %v1477_v53 = vld [vmem:[%s3480_s5 + $0x30] sm:$0xff] }
  0x2c   : > { %2327 = vmatmul.mubr.msk.f32.gmra.mrb[12].mxu0 %vm357_vm0, %v297_v41  ;;  %2689 = vmatprep.subr.bf16.mxu1 %v2688_v54 }
  0x2d   : > { %2329 = vmatprep.mubr.msk.f32.mxu0 %vm357_vm0, %v298_v44  ;;  %v1475_v44 = vld [vmem:[%s3480_s5 + $0x20] sm:$0xff]  ;;  %2697 = vmatprep.subr.bf16.mxu0 %v2696_v38 }
  0x2e   : > { %2375 = vmatmul.mubr.msk.f32.gmra.mrb[12].mxu1 %vm357_vm0, %v329_v59  ;;  %2699 = vmatpush3.bf16.msra.mxu0 %v2696_v38  ;;  %v2704_v49 = vpack.c.bf16 %v1476_v45, %v1475_v44 }
  0x2f   : > { %2377 = vmatprep.mubr.msk.f32.mxu1 %vm357_vm0, %v330_v60  ;;  %2691 = vmatpush3.bf16.msra.mxu1 %v2688_v54  ;;  %v1478_v54 = vld [vmem:[%s3480_s5 + $0x38] sm:$0xff] }
  0x30   : > { %2330 = vmatmul.mubr.msk.f32.gmra.mrb[14].mxu0 %vm357_vm0, %v299_v48  ;;  %2693 = vmatprep.subr.bf16.mxu1 %v2692_v61  ;;  %v2708_v60 = vpack.c.bf16 %v1478_v54, %v1477_v53 }
  0x31   : > { %2332 = vmatprep.mubr.msk.f32.mxu0 %vm357_vm0, %v300_v51  ;;  %2701 = vmatprep.subr.bf16.mxu0 %v2700_v43 }
  0x32   : > { %2378 = vmatmul.mubr.msk.f32.gmra.mrb[14].mxu1 %vm357_vm0, %v331_v0  ;;  %2703 = vmatpush3.bf16.msra.mxu0 %v2700_v43  ;;  %v1479_v0 = vld [vmem:[%s3480_s5 + $0x40] sm:$0xff] }
  0x33   : > { %2380 = vmatprep.mubr.msk.f32.mxu1 %vm357_vm0, %v332_v1  ;;  %2695 = vmatpush3.bf16.msra.mxu1 %v2692_v61  ;;  %v1480_v1 = vld [vmem:[%s3480_s5 + $0x48] sm:$0xff] }
  0x34   : > { %2333 = vmatmul.mubr.msk.f32.gmra.mrb[16].mxu0 %vm357_vm0, %v301_v55  ;;  %2705 = vmatprep.subr.bf16.mxu0 %v2704_v49 }
  0x35   : > { %2335 = vmatprep.mubr.msk.f32.mxu0 %vm357_vm0, %v302_v58 }
  0x36   : > { %2381 = vmatmul.mubr.msk.f32.gmra.mrb[16].mxu1 %vm357_vm0, %v333_v4  ;;  %2707 = vmatpush3.bf16.msra.mxu0 %v2704_v49 }
  0x37   : > { %2383 = vmatprep.mubr.msk.f32.mxu1 %vm357_vm0, %v334_v5  ;;  %2709 = vmatprep.subr.bf16.mxu0 %v2708_v60 }
  0x38   : > { %2336 = vmatmul.mubr.msk.f32.gmra.mrb[18].mxu0 %vm357_vm0, %v303_v62 }
  0x39   : > { %2338 = vmatprep.mubr.msk.f32.mxu0 %vm357_vm0, %v304_v63 }
  0x3a   : > { %2384 = vmatmul.mubr.msk.f32.gmra.mrb[18].mxu1 %vm357_vm0, %v335_v8  ;;  %2711 = vmatpush3.bf16.msra.mxu0 %v2708_v60 }
  0x3b   : > { %2386 = vmatprep.mubr.msk.f32.mxu1 %vm357_vm0, %v336_v9 }
  0x3c   : > { %2339 = vmatmul.mubr.msk.f32.gmra.mrb[20].mxu0 %vm357_vm0, %v305_v2 }
  0x3d   : > { %2341 = vmatprep.mubr.msk.f32.mxu0 %vm357_vm0, %v306_v3 }
  0x3e   : > { %2387 = vmatmul.mubr.msk.f32.gmra.mrb[20].mxu1 %vm357_vm0, %v337_v12  ;;  %v1482_v12 = vld [vmem:[%s3480_s5 + $0x58] sm:$0xff] }
  0x3f   : > { %2389 = vmatprep.mubr.msk.f32.mxu1 %vm357_vm0, %v338_v13 }
  0x40   : > { %2342 = vmatmul.mubr.msk.f32.gmra.mrb[22].mxu0 %vm357_vm0, %v307_v6 }
  0x41   : > { %2344 = vmatprep.mubr.msk.f32.mxu0 %vm357_vm0, %v308_v7  ;;  %v2712_v7 = vpack.c.bf16 %v1480_v1, %v1479_v0 }
  0x42   : > { %2390 = vmatmul.mubr.msk.f32.gmra.mrb[22].mxu1 %vm357_vm0, %v339_v16 }
  0x43   : > { %2392 = vmatprep.mubr.msk.f32.mxu1 %vm357_vm0, %v340_v17  ;;  %2713 = vmatprep.subr.bf16.mxu0 %v2712_v7 }
  0x44   : > { %2345 = vmatmul.mubr.msk.f32.gmra.mrb[24].mxu0 %vm357_vm0, %v309_v10 }
  0x45   : > { %2347 = vmatprep.mubr.msk.f32.mxu0 %vm357_vm0, %v310_v11  ;;  %v1481_v11 = vld [vmem:[%s3480_s5 + $0x50] sm:$0xff]  ;;  %2715 = vmatpush3.bf16.msra.mxu0 %v2712_v7 }
  0x46   : > { %2393 = vmatmul.mubr.msk.f32.gmra.mrb[24].mxu1 %vm357_vm0, %v341_v20 }
  0x47   : > { %2395 = vmatprep.mubr.msk.f32.mxu1 %vm357_vm0, %v342_v21 }
  0x48   : > { %2348 = vmatmul.mubr.msk.f32.gmra.mrb[26].mxu0 %vm357_vm0, %v311_v14 }
  0x49   : > { %2350 = vmatprep.mubr.msk.f32.mxu0 %vm357_vm0, %v312_v15 }
  0x4a   : > { %2396 = vmatmul.mubr.msk.f32.gmra.mrb[26].mxu1 %vm357_vm0, %v343_v23  ;;  %v1484_v23 = vld [vmem:[%s3480_s5 + $0x68] sm:$0xff] }
  0x4b   : > { %2398 = vmatprep.mubr.msk.f32.mxu1 %vm357_vm0, %v344_v24 }
  0x4c   : > { %2351 = vmatmul.mubr.msk.f32.gmra.mrb[28].mxu0 %vm357_vm0, %v313_v18  ;;  %v2716_v18 = vpack.c.bf16 %v1482_v12, %v1481_v11 }
  0x4d   : > { %2353 = vmatprep.mubr.msk.f32.mxu0 %vm357_vm0, %v314_v19 }
  0x4e   : > { %2399 = vmatmul.mubr.msk.f32.gmra.mrb[28].mxu1 %vm357_vm0, %v345_v25  ;;  %2717 = vmatprep.subr.bf16.mxu0 %v2716_v18 }
  0x4f   : > { %2401 = vmatprep.mubr.msk.f32.mxu1 %vm357_vm0, %v346_v26  ;;  %2719 = vmatpush3.bf16.msra.mxu0 %v2716_v18 }
  0x50   : > { %2354 = vmatmul.mubr.msk.f32.gmra.mrb[30].mxu0 %vm357_vm0, %v315_v22  ;;  %v1483_v22 = vld [vmem:[%s3480_s5 + $0x60] sm:$0xff] }
  0x52   : > { %2402 = vmatmul.mubr.msk.f32.gmra.mrb[30].mxu1 %vm357_vm0, %v347_v27 }
  0xe7   : > { %v2310_v29 = vpop.f32.mrb[0].mxu0 }
  0xe8   : > { %v622_v30 = vadd.f32 %v2310_v29, %v2992_v28  ;;  %v616_v31 = vpop.f32.mrb[1].mxu0 }
  0xe9   : > { %v617_v32 = vadd.f32 %v2992_v28, %v616_v31  ;;  %v3024_v56 = vpop.f32.mrb[0].mxu1 }
  0xea   : > { %v936_v40 = vmax.f32 %v622_v30, 0.0  ;;  %v3026_v57 = vpop.f32.mrb[1].mxu1  ;;  %v2720_v30 = vpack.c.bf16 %v1484_v23, %v1483_v22 }
  0xeb   : > { %v935_v36 = vmax.f32 %v617_v32, 0.0  ;;  %v2313_v37 = vpop.f32.mrb[2].mxu0 }
  0xec   : > { %v632_v41 = vadd.f32 %v2313_v37, %v2992_v28  ;;  %v626_v42 = vpop.f32.mrb[3].mxu0  ;;  %2721 = vmatprep.subr.bf16.mxu0 %v2720_v30 }
  0xed   : > { %v627_v46 = vadd.f32 %v2992_v28, %v626_v42  ;;  %2436 = vmatprep.mubr.f32.mxu1 %v935_v36  ;;  %v3036_v3 = vpop.f32.mrb[2].mxu1  ;;  %2723 = vmatpush3.bf16.msra.mxu0 %v2720_v30 }
  0xee   : > { %2437 = vmatmul.mubr.f32.vlgmr.msra.gmra.mrb[32].mxu1 %v936_v40  ;;  %v938_v50 = vmax.f32 %v632_v41, 0.0  ;;  %v3038_v4 = vpop.f32.mrb[3].mxu1  ;;  %v2724_v41 = vpack.c.bf16 %v1486_v35, %v1485_v34 }
  0xef   : > { %v937_v47 = vmax.f32 %v627_v46, 0.0  ;;  %v2316_v48 = vpop.f32.mrb[4].mxu0 }
  0xf0   : > { %v642_v51 = vadd.f32 %v2316_v48, %v2992_v28  ;;  %v636_v52 = vpop.f32.mrb[5].mxu0  ;;  %2725 = vmatprep.subr.bf16.mxu0 %v2724_v41 }
  0xf1   : > { %v637_v55 = vadd.f32 %v2992_v28, %v636_v52  ;;  %2439 = vmatprep.mubr.f32.mxu1 %v937_v47  ;;  %v3048_v14 = vpop.f32.mrb[4].mxu1  ;;  %2727 = vmatpush3.bf16.msra.mxu0 %v2724_v41 }
  0xf2   : > { %2440 = vmatmul.mubr.f32.gmra.mrb[34].mxu1 %v938_v50  ;;  %v940_v61 = vmax.f32 %v642_v51, 0.0  ;;  %v3050_v15 = vpop.f32.mrb[5].mxu1 }
  0xf3   : > { %v939_v58 = vmax.f32 %v637_v55, 0.0  ;;  %v2319_v59 = vpop.f32.mrb[6].mxu0 }
  0xf4   : > { %v652_v62 = vadd.f32 %v2319_v59, %v2992_v28  ;;  %v646_v63 = vpop.f32.mrb[7].mxu0 }
  0xf5   : > { %v647_v2 = vadd.f32 %v2992_v28, %v646_v63  ;;  %2442 = vmatprep.mubr.f32.mxu1 %v939_v58  ;;  %v3060_v25 = vpop.f32.mrb[6].mxu1 }
  0xf6   : > { %2443 = vmatmul.mubr.f32.gmra.mrb[36].mxu1 %v940_v61  ;;  %v942_v8 = vmax.f32 %v652_v62, 0.0  ;;  %v3062_v26 = vpop.f32.mrb[7].mxu1 }
  0xf7   : > { %v941_v5 = vmax.f32 %v647_v2, 0.0  ;;  %v2322_v6 = vpop.f32.mrb[8].mxu0 }
  0xf8   : > { %v662_v9 = vadd.f32 %v2322_v6, %v2992_v28  ;;  %v656_v10 = vpop.f32.mrb[9].mxu0 }
  0xf9   : > { %v657_v13 = vadd.f32 %v2992_v28, %v656_v10  ;;  %2445 = vmatprep.mubr.f32.mxu1 %v941_v5  ;;  %v3072_v37 = vpop.f32.mrb[8].mxu1 }
  0xfa   : > { %2446 = vmatmul.mubr.f32.gmra.mrb[38].mxu1 %v942_v8  ;;  %v944_v19 = vmax.f32 %v662_v9, 0.0  ;;  %v3074_v38 = vpop.f32.mrb[9].mxu1 }
  0xfb   : > { %v943_v16 = vmax.f32 %v657_v13, 0.0  ;;  %v2325_v17 = vpop.f32.mrb[10].mxu0 }
  0xfc   : > { %v672_v20 = vadd.f32 %v2325_v17, %v2992_v28  ;;  %v666_v21 = vpop.f32.mrb[11].mxu0 }
  0xfd   : > { %v667_v24 = vadd.f32 %v2992_v28, %v666_v21  ;;  %2448 = vmatprep.mubr.f32.mxu1 %v943_v16  ;;  %v3078_v46 = vpop.f32.mrb[10].mxu1 }
  0xfe   : > { %2449 = vmatmul.mubr.f32.gmra.mrb[40].mxu1 %v944_v19  ;;  %v946_v31 = vmax.f32 %v672_v20, 0.0  ;;  %v3080_v47 = vpop.f32.mrb[11].mxu1 }
  0xff   : > { %v945_v27 = vmax.f32 %v667_v24, 0.0  ;;  %v2328_v29 = vpop.f32.mrb[12].mxu0 }
 0x100   : > { %v682_v32 = vadd.f32 %v2328_v29, %v2992_v28  ;;  %v676_v33 = vpop.f32.mrb[13].mxu0 }
 0x101   : > { %v677_v36 = vadd.f32 %v2992_v28, %v676_v33  ;;  %2451 = vmatprep.mubr.f32.mxu1 %v945_v27  ;;  %v3084_v54 = vpop.f32.mrb[12].mxu1 }
 0x102   : > { %2452 = vmatmul.mubr.f32.gmra.mrb[42].mxu1 %v946_v31  ;;  %v948_v42 = vmax.f32 %v682_v32, 0.0  ;;  %v3086_v55 = vpop.f32.mrb[13].mxu1 }
 0x103   : > { %v947_v39 = vmax.f32 %v677_v36, 0.0  ;;  %v2331_v40 = vpop.f32.mrb[14].mxu0 }
 0x104   : > { %v692_v43 = vadd.f32 %v2331_v40, %v2992_v28  ;;  %v686_v44 = vpop.f32.mrb[15].mxu0 }
 0x105   : > { %v687_v45 = vadd.f32 %v2992_v28, %v686_v44  ;;  %2454 = vmatprep.mubr.f32.mxu1 %v947_v39  ;;  %v3090_v0 = vpop.f32.mrb[14].mxu1 }
 0x106   : > { %2455 = vmatmul.mubr.f32.gmra.mrb[44].mxu1 %v948_v42  ;;  %v950_v50 = vmax.f32 %v692_v43, 0.0  ;;  %v3092_v1 = vpop.f32.mrb[15].mxu1 }
 0x107   : > { %v949_v48 = vmax.f32 %v687_v45, 0.0  ;;  %v2334_v49 = vpop.f32.mrb[16].mxu0 }
 0x108   : > { %v702_v51 = vadd.f32 %v2334_v49, %v2992_v28  ;;  %v696_v52 = vpop.f32.mrb[17].mxu0 }
 0x109   : > { %v697_v53 = vadd.f32 %v2992_v28, %v696_v52  ;;  %2457 = vmatprep.mubr.f32.mxu1 %v949_v48  ;;  %v3096_v10 = vpop.f32.mrb[16].mxu1 }
 0x10a   : > { %2458 = vmatmul.mubr.f32.gmra.mrb[46].mxu1 %v950_v50  ;;  %v952_v60 = vmax.f32 %v702_v51, 0.0  ;;  %v3098_v11 = vpop.f32.mrb[17].mxu1 }
 0x10b   : > { %v951_v58 = vmax.f32 %v697_v53, 0.0  ;;  %v2337_v59 = vpop.f32.mrb[18].mxu0 }
 0x10c   : > { %v712_v61 = vadd.f32 %v2337_v59, %v2992_v28  ;;  %v706_v62 = vpop.f32.mrb[19].mxu0  ;;  %v777_v59 = vadd.f32 %v2992_v28, %v3026_v57  ;;  %v782_v57 = vadd.f32 %v3024_v56, %v2992_v28 }
 0x10d   : > { %v707_v63 = vadd.f32 %v2992_v28, %v706_v62  ;;  %2460 = vmatprep.mubr.f32.mxu1 %v951_v58  ;;  %v3102_v20 = vpop.f32.mrb[18].mxu1 }
 0x10e   : > { %2461 = vmatmul.mubr.f32.gmra.mrb[48].mxu1 %v952_v60  ;;  %v954_v6 = vmax.f32 %v712_v61, 0.0  ;;  %v3104_v21 = vpop.f32.mrb[19].mxu1 }
 0x10f   : > { %v953_v2 = vmax.f32 %v707_v63, 0.0  ;;  %v2340_v5 = vpop.f32.mrb[20].mxu0 }
 0x110   : > { %v722_v7 = vadd.f32 %v2340_v5, %v2992_v28  ;;  %v716_v8 = vpop.f32.mrb[21].mxu0 }
 0x111   : > { %v717_v9 = vadd.f32 %v2992_v28, %v716_v8  ;;  %2463 = vmatprep.mubr.f32.mxu1 %v953_v2  ;;  %v3108_v31 = vpop.f32.mrb[20].mxu1  ;;  %v787_v8 = vadd.f32 %v2992_v28, %v3038_v4 }
 0x112   : > { %2464 = vmatmul.mubr.f32.gmra.mrb[50].mxu1 %v954_v6  ;;  %v956_v16 = vmax.f32 %v722_v7, 0.0  ;;  %v3110_v32 = vpop.f32.mrb[21].mxu1  ;;  %v967_v7 = vmax.f32 %v777_v59, 0.0 }
 0x113   : > { %v955_v12 = vmax.f32 %v717_v9, 0.0  ;;  %v2343_v13 = vpop.f32.mrb[22].mxu0 }
 0x114   : > { %v732_v17 = vadd.f32 %v2343_v13, %v2992_v28  ;;  %v726_v18 = vpop.f32.mrb[23].mxu0 }
 0x115   : > { %v727_v19 = vadd.f32 %v2992_v28, %v726_v18  ;;  %2466 = vmatprep.mubr.f32.mxu1 %v955_v12  ;;  %v3114_v41 = vpop.f32.mrb[22].mxu1  ;;  %v968_v18 = vmax.f32 %v782_v57, 0.0 }
 0x116   : > { %2467 = vmatmul.mubr.f32.gmra.mrb[52].mxu1 %v956_v16  ;;  %v958_v24 = vmax.f32 %v732_v17, 0.0  ;;  %v3116_v42 = vpop.f32.mrb[23].mxu1  ;;  %v969_v16 = vmax.f32 %v787_v8, 0.0  ;;  %v797_v17 = vadd.f32 %v2992_v28, %v3050_v15 }
 0x117   : > { %v957_v22 = vmax.f32 %v727_v19, 0.0  ;;  %v2346_v23 = vpop.f32.mrb[24].mxu0  ;;  %v792_v19 = vadd.f32 %v3036_v3, %v2992_v28  ;;  %v817_v3 = vadd.f32 %v2992_v28, %v3074_v38  ;;  %v837_v38 = vadd.f32 %v2992_v28, %v3086_v55 }
 0x118   : > { %v742_v27 = vadd.f32 %v2346_v23, %v2992_v28  ;;  %v736_v29 = vpop.f32.mrb[25].mxu0  ;;  %v971_v56 = vmax.f32 %v797_v17, 0.0  ;;  %v807_v23 = vadd.f32 %v2992_v28, %v3062_v26  ;;  %v827_v26 = vadd.f32 %v2992_v28, %v3080_v47 }
 0x119   : > { %v737_v30 = vadd.f32 %v2992_v28, %v736_v29  ;;  %2469 = vmatprep.mubr.f32.mxu1 %v957_v22  ;;  %v3120_v51 = vpop.f32.mrb[24].mxu1  ;;  %v847_v47 = vadd.f32 %v2992_v28, %v3092_v1  ;;  %v857_v55 = vadd.f32 %v2992_v28, %v3098_v11  ;;  %v867_v1 = vadd.f32 %v2992_v28, %v3104_v21 }
 0x11a   : > { %2470 = vmatmul.mubr.f32.gmra.mrb[54].mxu1 %v958_v24  ;;  %v960_v35 = vmax.f32 %v742_v27, 0.0  ;;  %v3122_v52 = vpop.f32.mrb[25].mxu1  ;;  %v970_v24 = vmax.f32 %v792_v19, 0.0  ;;  %v802_v27 = vadd.f32 %v3048_v14, %v2992_v28  ;;  %v973_v15 = vmax.f32 %v807_v23, 0.0 }
 0x11b   : > { %v959_v33 = vmax.f32 %v737_v30, 0.0  ;;  %v2349_v34 = vpop.f32.mrb[26].mxu0  ;;  %v812_v30 = vadd.f32 %v3060_v25, %v2992_v28  ;;  %v822_v14 = vadd.f32 %v3072_v37, %v2992_v28  ;;  %v832_v25 = vadd.f32 %v3078_v46, %v2992_v28 }
 0x11c   : > { %v752_v36 = vadd.f32 %v2349_v34, %v2992_v28  ;;  %v746_v39 = vpop.f32.mrb[27].mxu0  ;;  %v972_v29 = vmax.f32 %v802_v27, 0.0  ;;  %v842_v37 = vadd.f32 %v3084_v54, %v2992_v28  ;;  %v852_v46 = vadd.f32 %v3090_v0, %v2992_v28 }
 0x11d   : > { %v747_v40 = vadd.f32 %v2992_v28, %v746_v39  ;;  %2472 = vmatprep.mubr.f32.mxu1 %v959_v33  ;;  %v3128_v2 = vpop.f32.mrb[26].mxu1  ;;  %v975_v33 = vmax.f32 %v817_v3, 0.0  ;;  %v974_v34 = vmax.f32 %v812_v30, 0.0  ;;  %v979_v39 = vmax.f32 %v837_v38, 0.0 }
 0x11e   : > { %2473 = vmatmul.mubr.f32.gmra.mrb[56].mxu1 %v960_v35  ;;  %v962_v45 = vmax.f32 %v752_v36, 0.0  ;;  %v3130_v5 = vpop.f32.mrb[27].mxu1  ;;  %v977_v35 = vmax.f32 %v827_v26, 0.0  ;;  %v976_v36 = vmax.f32 %v822_v14, 0.0  ;;  %v862_v54 = vadd.f32 %v3096_v10, %v2992_v28 }
 0x11f   : > { %v961_v43 = vmax.f32 %v747_v40, 0.0  ;;  %v2352_v44 = vpop.f32.mrb[28].mxu0  ;;  %v978_v40 = vmax.f32 %v832_v25, 0.0  ;;  %v877_v11 = vadd.f32 %v2992_v28, %v3110_v32  ;;  %v872_v0 = vadd.f32 %v3102_v20, %v2992_v28 }
 0x120   : > { %v762_v48 = vadd.f32 %v2352_v44, %v2992_v28  ;;  %v756_v49 = vpop.f32.mrb[29].mxu0  ;;  %v980_v44 = vmax.f32 %v842_v37, 0.0  ;;  %v887_v21 = vadd.f32 %v2992_v28, %v3116_v42  ;;  %v882_v10 = vadd.f32 %v3108_v31, %v2992_v28 }
 0x121   : > { %v757_v50 = vadd.f32 %v2992_v28, %v756_v49  ;;  %2475 = vmatprep.mubr.f32.mxu1 %v961_v43  ;;  %v3136_v12 = vpop.f32.mrb[28].mxu1  ;;  %v981_v43 = vmax.f32 %v847_v47, 0.0  ;;  %v985_v49 = vmax.f32 %v867_v1, 0.0  ;;  %v897_v32 = vadd.f32 %v2992_v28, %v3122_v52 }
 0x122   : > { %2476 = vmatmul.mubr.f32.gmra.mrb[58].mxu1 %v962_v45  ;;  %v964_v60 = vmax.f32 %v762_v48, 0.0  ;;  %v3138_v13 = vpop.f32.mrb[29].mxu1  ;;  %v983_v45 = vmax.f32 %v857_v55, 0.0  ;;  %v982_v48 = vmax.f32 %v852_v46, 0.0  ;;  %v989_v59 = vmax.f32 %v887_v21, 0.0 }
 0x123   : > { %v963_v53 = vmax.f32 %v757_v50, 0.0  ;;  %v2355_v58 = vpop.f32.mrb[30].mxu0  ;;  %v984_v50 = vmax.f32 %v862_v54, 0.0  ;;  %v892_v20 = vadd.f32 %v3114_v41, %v2992_v28  ;;  %v907_v42 = vadd.f32 %v2992_v28, %v3130_v5 }
 0x124   : > { %v772_v61 = vadd.f32 %v2355_v58, %v2992_v28  ;;  %v766_v62 = vpop.f32.mrb[31].mxu0  ;;  %v986_v58 = vmax.f32 %v872_v0, 0.0  ;;  %v902_v31 = vadd.f32 %v3120_v51, %v2992_v28  ;;  %v917_v52 = vadd.f32 %v2992_v28, %v3138_v13 }
 0x125   : > { %v767_v63 = vadd.f32 %v2992_v28, %v766_v62  ;;  %2478 = vmatprep.mubr.f32.mxu1 %v963_v53  ;;  %v3144_v4 = vpop.f32.mrb[30].mxu1  ;;  %v987_v53 = vmax.f32 %v877_v11, 0.0  ;;  %v990_v62 = vmax.f32 %v892_v20, 0.0  ;;  %v912_v41 = vadd.f32 %v3128_v2, %v2992_v28 }
 0x126   : > { %2479 = vmatmul.mubr.f32.gmra.mrb[60].mxu1 %v964_v60  ;;  %v966_v9 = vmax.f32 %v772_v61, 0.0  ;;  %v3146_v22 = vpop.f32.mrb[31].mxu1  ;;  %v988_v60 = vmax.f32 %v882_v10, 0.0  ;;  %v991_v61 = vmax.f32 %v897_v32, 0.0  ;;  %v922_v51 = vadd.f32 %v3136_v12, %v2992_v28 }
 0x127   : > { %v965_v6 = vmax.f32 %v767_v63, 0.0  ;;  %v993_v63 = vmax.f32 %v907_v42, 0.0  ;;  %v927_v5 = vadd.f32 %v2992_v28, %v3146_v22  ;;  %v994_v8 = vmax.f32 %v912_v41, 0.0 }
 0x128   : > { %v996_v57 = vmax.f32 %v922_v51, 0.0  ;;  %v932_v13 = vadd.f32 %v3144_v4, %v2992_v28 }
 0x129   : > { %2481 = vmatprep.mubr.f32.mxu1 %v965_v6  ;;  %v992_v6 = vmax.f32 %v902_v31, 0.0 }
 0x12a   : > { %2482 = vmatmul.mubr.f32.gmra.mrb[62].mxu1 %v966_v9  ;;  %v997_v9 = vmax.f32 %v927_v5, 0.0  ;;  %v998_v2 = vmax.f32 %v932_v13, 0.0 }
 0x12b   : > { %2484 = vmatprep.mubr.f32.mxu1 %v967_v7  ;;  %v995_v7 = vmax.f32 %v917_v52, 0.0 }
 0x12e   : > { %2485 = vmatmul.mubr.f32.gmra.mrb[64].mxu1 %v968_v18 }
 0x12f   : > { %2487 = vmatprep.mubr.f32.mxu1 %v969_v16  ;;  %v3205_v16 = vld [vmem:[%s3479_s4] ss:$0 sm:$0xff] }
 0x132   : > { %2488 = vmatmul.mubr.f32.gmra.mrb[66].mxu1 %v970_v24 }
 0x133   : > { %2490 = vmatprep.mubr.f32.mxu1 %v971_v56 }
 0x136   : > { %2491 = vmatmul.mubr.f32.gmra.mrb[68].mxu1 %v972_v29 }
 0x137   : > { %2493 = vmatprep.mubr.f32.mxu1 %v973_v15 }
 0x13a   : > { %2494 = vmatmul.mubr.f32.gmra.mrb[70].mxu1 %v974_v34 }
 0x13b   : > { %2496 = vmatprep.mubr.f32.mxu1 %v975_v33 }
 0x13e   : > { %2497 = vmatmul.mubr.f32.gmra.mrb[72].mxu1 %v976_v36 }
 0x13f   : > { %2499 = vmatprep.mubr.f32.mxu1 %v977_v35 }
 0x142   : > { %2500 = vmatmul.mubr.f32.gmra.mrb[74].mxu1 %v978_v40 }
 0x143   : > { %2502 = vmatprep.mubr.f32.mxu1 %v979_v39 }
 0x146   : > { %2503 = vmatmul.mubr.f32.gmra.mrb[76].mxu1 %v980_v44 }
 0x147   : > { %2505 = vmatprep.mubr.f32.mxu1 %v981_v43 }
 0x14a   : > { %2506 = vmatmul.mubr.f32.gmra.mrb[78].mxu1 %v982_v48 }
 0x14b   : > { %2508 = vmatprep.mubr.f32.mxu1 %v983_v45 }
 0x14e   : > { %2509 = vmatmul.mubr.f32.gmra.mrb[80].mxu1 %v984_v50 }
 0x14f   : > { %2511 = vmatprep.mubr.f32.mxu1 %v985_v49 }
 0x152   : > { %2512 = vmatmul.mubr.f32.gmra.mrb[82].mxu1 %v986_v58 }
 0x153   : > { %2514 = vmatprep.mubr.f32.mxu1 %v987_v53 }
 0x156   : > { %2515 = vmatmul.mubr.f32.gmra.mrb[84].mxu1 %v988_v60 }
 0x157   : > { %2517 = vmatprep.mubr.f32.mxu1 %v989_v59 }
 0x15a   : > { %2518 = vmatmul.mubr.f32.gmra.mrb[86].mxu1 %v990_v62 }
 0x15b   : > { %2520 = vmatprep.mubr.f32.mxu1 %v991_v61 }
 0x15e   : > { %2521 = vmatmul.mubr.f32.gmra.mrb[88].mxu1 %v992_v6 }
 0x15f   : > { %2523 = vmatprep.mubr.f32.mxu1 %v993_v63 }
 0x162   : > { %2524 = vmatmul.mubr.f32.gmra.mrb[90].mxu1 %v994_v8 }
 0x163   : > { %2526 = vmatprep.mubr.f32.mxu1 %v995_v7 }
 0x166   : > { %2527 = vmatmul.mubr.f32.gmra.mrb[92].mxu1 %v996_v57 }
 0x167   : > { %2529 = vmatprep.mubr.f32.mxu1 %v997_v9 }
 0x16a   : > { %2530 = vmatmul.mubr.f32.gmra.mrb[94].mxu1 %v998_v2 }
 0x1c1   : > { %v2438_v17 = vpop.f32.mrb[32].mxu1 }
 0x1c2   : > { %v1094_v18 = vadd.f32 %v2438_v17, %v3205_v16  ;;  %v1088_v12 = vpop.f32.mrb[33].mxu1 }
 0x1c3   : > { %v1089_v19 = vadd.f32 %v3205_v16, %v1088_v12 }
 0x1c4   : > { %v1408_v23 = vmax.f32 %v1094_v18, 0.0 }
 0x1c5   : > { %v1407_v22 = vmax.f32 %v1089_v19, 0.0  ;;  %v2441_v56 = vpop.f32.mrb[34].mxu1 }
 0x1c6   : > { %v1104_v28 = vadd.f32 %v2441_v56, %v3205_v16  ;;  %v1098_v4 = vpop.f32.mrb[35].mxu1 }
 0x1c7   : > { %v1099_v24 = vadd.f32 %v3205_v16, %v1098_v4  ;;  %2564 = vmatprep.mubr.f32.mxu0 %v1407_v22 }
 0x1c8   : > { %2565 = vmatmul.mubr.f32.vlgmr.msra.gmra.mrb[32].mxu0 %v1408_v23  ;;  %v1410_v3 = vmax.f32 %v1104_v28, 0.0 }
 0x1c9   : > { %v1409_v27 = vmax.f32 %v1099_v24, 0.0  ;;  %v2444_v15 = vpop.f32.mrb[36].mxu1 }
 0x1ca   : > { %v1114_v29 = vadd.f32 %v2444_v15, %v3205_v16  ;;  %v1108_v30 = vpop.f32.mrb[37].mxu1 }
 0x1cb   : > { %v1109_v33 = vadd.f32 %v3205_v16, %v1108_v30  ;;  %2567 = vmatprep.mubr.f32.mxu0 %v1409_v27 }
 0x1cc   : > { %2568 = vmatmul.mubr.f32.gmra.mrb[34].mxu0 %v1410_v3  ;;  %v1412_v14 = vmax.f32 %v1114_v29, 0.0 }
 0x1cd   : > { %v1411_v26 = vmax.f32 %v1109_v33, 0.0  ;;  %v2447_v34 = vpop.f32.mrb[38].mxu1 }
 0x1ce   : > { %v1124_v35 = vadd.f32 %v2447_v34, %v3205_v16  ;;  %v1118_v38 = vpop.f32.mrb[39].mxu1 }
 0x1cf   : > { %v1119_v36 = vadd.f32 %v3205_v16, %v1118_v38  ;;  %2570 = vmatprep.mubr.f32.mxu0 %v1411_v26 }
 0x1d0   : > { %2571 = vmatmul.mubr.f32.gmra.mrb[36].mxu0 %v1412_v14  ;;  %v1414_v47 = vmax.f32 %v1124_v35, 0.0 }
 0x1d1   : > { %v1413_v25 = vmax.f32 %v1119_v36, 0.0  ;;  %v2450_v39 = vpop.f32.mrb[40].mxu1 }
 0x1d2   : > { %v1134_v40 = vadd.f32 %v2450_v39, %v3205_v16  ;;  %v1128_v37 = vpop.f32.mrb[41].mxu1 }
 0x1d3   : > { %v1129_v43 = vadd.f32 %v3205_v16, %v1128_v37  ;;  %2573 = vmatprep.mubr.f32.mxu0 %v1413_v25 }
 0x1d4   : > { %2574 = vmatmul.mubr.f32.gmra.mrb[38].mxu0 %v1414_v47  ;;  %v1416_v46 = vmax.f32 %v1134_v40, 0.0 }
 0x1d5   : > { %v1415_v55 = vmax.f32 %v1129_v43, 0.0  ;;  %v2453_v44 = vpop.f32.mrb[42].mxu1 }
 0x1d6   : > { %v1144_v45 = vadd.f32 %v2453_v44, %v3205_v16  ;;  %v1138_v1 = vpop.f32.mrb[43].mxu1 }
 0x1d7   : > { %v1139_v48 = vadd.f32 %v3205_v16, %v1138_v1  ;;  %2576 = vmatprep.mubr.f32.mxu0 %v1415_v55 }
 0x1d8   : > { %2577 = vmatmul.mubr.f32.gmra.mrb[40].mxu0 %v1416_v46  ;;  %v1418_v11 = vmax.f32 %v1144_v45, 0.0 }
 0x1d9   : > { %v1417_v54 = vmax.f32 %v1139_v48, 0.0  ;;  %v2456_v49 = vpop.f32.mrb[44].mxu1 }
 0x1da   : > { %v1154_v50 = vadd.f32 %v2456_v49, %v3205_v16  ;;  %v1148_v0 = vpop.f32.mrb[45].mxu1 }
 0x1db   : > { %v1149_v53 = vadd.f32 %v3205_v16, %v1148_v0  ;;  %2579 = vmatprep.mubr.f32.mxu0 %v1417_v54 }
 0x1dc   : > { %2580 = vmatmul.mubr.f32.gmra.mrb[42].mxu0 %v1418_v11  ;;  %v1420_v10 = vmax.f32 %v1154_v50, 0.0 }
 0x1dd   : > { %v1419_v21 = vmax.f32 %v1149_v53, 0.0  ;;  %v2459_v58 = vpop.f32.mrb[46].mxu1 }
 0x1de   : > { %v1164_v59 = vadd.f32 %v2459_v58, %v3205_v16  ;;  %v1158_v32 = vpop.f32.mrb[47].mxu1 }
 0x1df   : > { %v1159_v60 = vadd.f32 %v3205_v16, %v1158_v32  ;;  %2582 = vmatprep.mubr.f32.mxu0 %v1419_v21 }
 0x1e0   : > { %2583 = vmatmul.mubr.f32.gmra.mrb[44].mxu0 %v1420_v10  ;;  %v1422_v42 = vmax.f32 %v1164_v59, 0.0 }
 0x1e1   : > { %v1421_v20 = vmax.f32 %v1159_v60, 0.0  ;;  %v2462_v61 = vpop.f32.mrb[48].mxu1 }
 0x1e2   : > { %v1174_v62 = vadd.f32 %v2462_v61, %v3205_v16  ;;  %v1168_v31 = vpop.f32.mrb[49].mxu1 }
 0x1e3   : > { %v1169_v63 = vadd.f32 %v3205_v16, %v1168_v31  ;;  %2585 = vmatprep.mubr.f32.mxu0 %v1421_v20 }
 0x1e4   : > { %2586 = vmatmul.mubr.f32.gmra.mrb[46].mxu0 %v1422_v42  ;;  %v1424_v41 = vmax.f32 %v1174_v62, 0.0 }
 0x1e5   : > { %v1423_v52 = vmax.f32 %v1169_v63, 0.0  ;;  %v2465_v6 = vpop.f32.mrb[50].mxu1 }
 0x1e6   : > { %v1184_v7 = vadd.f32 %v2465_v6, %v3205_v16  ;;  %v1178_v5 = vpop.f32.mrb[51].mxu1 }
 0x1e7   : > { %v1179_v8 = vadd.f32 %v3205_v16, %v1178_v5  ;;  %2588 = vmatprep.mubr.f32.mxu0 %v1423_v52 }
 0x1e8   : > { %2589 = vmatmul.mubr.f32.gmra.mrb[48].mxu0 %v1424_v41  ;;  %v1426_v57 = vmax.f32 %v1184_v7, 0.0 }
 0x1e9   : > { %v1425_v51 = vmax.f32 %v1179_v8, 0.0  ;;  %v2468_v9 = vpop.f32.mrb[52].mxu1 }
 0x1ea   : > { %v1194_v13 = vadd.f32 %v2468_v9, %v3205_v16  ;;  %v1188_v2 = vpop.f32.mrb[53].mxu1 }
 0x1eb   : > { %v1189_v17 = vadd.f32 %v3205_v16, %v1188_v2  ;;  %2591 = vmatprep.mubr.f32.mxu0 %v1425_v51 }
 0x1ec   : > { %2592 = vmatmul.mubr.f32.gmra.mrb[50].mxu0 %v1426_v57  ;;  %v1428_v19 = vmax.f32 %v1194_v13, 0.0 }
 0x1ed   : > { %v1427_v18 = vmax.f32 %v1189_v17, 0.0  ;;  %v2471_v12 = vpop.f32.mrb[54].mxu1 }
 0x1ee   : > { %v1204_v22 = vadd.f32 %v2471_v12, %v3205_v16  ;;  %v1198_v56 = vpop.f32.mrb[55].mxu1 }
 0x1ef   : > { %v1199_v23 = vadd.f32 %v3205_v16, %v1198_v56  ;;  %2594 = vmatprep.mubr.f32.mxu0 %v1427_v18 }
 0x1f0   : > { %2595 = vmatmul.mubr.f32.gmra.mrb[52].mxu0 %v1428_v19  ;;  %v1430_v24 = vmax.f32 %v1204_v22, 0.0 }
 0x1f1   : > { %v1429_v28 = vmax.f32 %v1199_v23, 0.0  ;;  %v2474_v4 = vpop.f32.mrb[56].mxu1 }
 0x1f2   : > { %v1214_v27 = vadd.f32 %v2474_v4, %v3205_v16  ;;  %v1208_v15 = vpop.f32.mrb[57].mxu1 }
 0x1f3   : > { %v1209_v3 = vadd.f32 %v3205_v16, %v1208_v15  ;;  %2597 = vmatprep.mubr.f32.mxu0 %v1429_v28 }
 0x1f4   : > { %2598 = vmatmul.mubr.f32.gmra.mrb[54].mxu0 %v1430_v24  ;;  %v1432_v33 = vmax.f32 %v1214_v27, 0.0 }
 0x1f5   : > { %v1431_v29 = vmax.f32 %v1209_v3, 0.0  ;;  %v2477_v30 = vpop.f32.mrb[58].mxu1 }
 0x1f6   : > { %v1224_v26 = vadd.f32 %v2477_v30, %v3205_v16  ;;  %v1218_v34 = vpop.f32.mrb[59].mxu1 }
 0x1f7   : > { %v1219_v14 = vadd.f32 %v3205_v16, %v1218_v34  ;;  %2600 = vmatprep.mubr.f32.mxu0 %v1431_v29 }
 0x1f8   : > { %2601 = vmatmul.mubr.f32.gmra.mrb[56].mxu0 %v1432_v33  ;;  %v1434_v36 = vmax.f32 %v1224_v26, 0.0 }
 0x1f9   : > { %v1433_v35 = vmax.f32 %v1219_v14, 0.0  ;;  %v2480_v38 = vpop.f32.mrb[60].mxu1 }
 0x1fa   : > { %v1234_v25 = vadd.f32 %v2480_v38, %v3205_v16  ;;  %v1228_v39 = vpop.f32.mrb[61].mxu1 }
 0x1fb   : > { %v1229_v47 = vadd.f32 %v3205_v16, %v1228_v39  ;;  %2603 = vmatprep.mubr.f32.mxu0 %v1433_v35 }
 0x1fc   : > { %2604 = vmatmul.mubr.f32.gmra.mrb[58].mxu0 %v1434_v36  ;;  %v1436_v43 = vmax.f32 %v1234_v25, 0.0 }
 0x1fd   : > { %v1435_v40 = vmax.f32 %v1229_v47, 0.0  ;;  %v2483_v37 = vpop.f32.mrb[62].mxu1 }
 0x1fe   : > { %v1244_v55 = vadd.f32 %v2483_v37, %v3205_v16  ;;  %v1238_v44 = vpop.f32.mrb[63].mxu1 }
 0x1ff   : > { %v1239_v46 = vadd.f32 %v3205_v16, %v1238_v44  ;;  %2606 = vmatprep.mubr.f32.mxu0 %v1435_v40 }
 0x200   : > { %2607 = vmatmul.mubr.f32.gmra.mrb[60].mxu0 %v1436_v43  ;;  %v1438_v48 = vmax.f32 %v1244_v55, 0.0 }
 0x201   : > { %v1437_v45 = vmax.f32 %v1239_v46, 0.0  ;;  %v2486_v1 = vpop.f32.mrb[64].mxu1 }
 0x202   : > { %v1254_v54 = vadd.f32 %v2486_v1, %v3205_v16  ;;  %v1248_v49 = vpop.f32.mrb[65].mxu1 }
 0x203   : > { %v1249_v11 = vadd.f32 %v3205_v16, %v1248_v49  ;;  %2609 = vmatprep.mubr.f32.mxu0 %v1437_v45 }
 0x204   : > { %2610 = vmatmul.mubr.f32.gmra.mrb[62].mxu0 %v1438_v48  ;;  %v1440_v53 = vmax.f32 %v1254_v54, 0.0 }
 0x205   : > { %v1439_v50 = vmax.f32 %v1249_v11, 0.0  ;;  %v2489_v0 = vpop.f32.mrb[66].mxu1 }
 0x206   : > { %v1264_v21 = vadd.f32 %v2489_v0, %v3205_v16  ;;  %v1258_v58 = vpop.f32.mrb[67].mxu1 }
 0x207   : > { %v1259_v10 = vadd.f32 %v3205_v16, %v1258_v58  ;;  %2612 = vmatprep.mubr.f32.mxu0 %v1439_v50 }
 0x208   : > { %2613 = vmatmul.mubr.f32.gmra.mrb[64].mxu0 %v1440_v53  ;;  %v1442_v60 = vmax.f32 %v1264_v21, 0.0 }
 0x209   : > { %v1441_v59 = vmax.f32 %v1259_v10, 0.0  ;;  %v2492_v32 = vpop.f32.mrb[68].mxu1 }
 0x20a   : > { %v1274_v20 = vadd.f32 %v2492_v32, %v3205_v16  ;;  %v1268_v61 = vpop.f32.mrb[69].mxu1 }
 0x20b   : > { %v1269_v42 = vadd.f32 %v3205_v16, %v1268_v61  ;;  %2615 = vmatprep.mubr.f32.mxu0 %v1441_v59 }
 0x20c   : > { %2616 = vmatmul.mubr.f32.gmra.mrb[66].mxu0 %v1442_v60  ;;  %v1444_v63 = vmax.f32 %v1274_v20, 0.0 }
 0x20d   : > { %v1443_v62 = vmax.f32 %v1269_v42, 0.0  ;;  %v2495_v31 = vpop.f32.mrb[70].mxu1 }
 0x20e   : > { %v1284_v52 = vadd.f32 %v2495_v31, %v3205_v16  ;;  %v1278_v6 = vpop.f32.mrb[71].mxu1 }
 0x20f   : > { %v1279_v41 = vadd.f32 %v3205_v16, %v1278_v6  ;;  %2618 = vmatprep.mubr.f32.mxu0 %v1443_v62 }
 0x210   : > { %2619 = vmatmul.mubr.f32.gmra.mrb[68].mxu0 %v1444_v63  ;;  %v1446_v8 = vmax.f32 %v1284_v52, 0.0 }
 0x211   : > { %v1445_v7 = vmax.f32 %v1279_v41, 0.0  ;;  %v2498_v5 = vpop.f32.mrb[72].mxu1 }
 0x212   : > { %v1294_v51 = vadd.f32 %v2498_v5, %v3205_v16  ;;  %v1288_v9 = vpop.f32.mrb[73].mxu1 }
 0x213   : > { %v1289_v57 = vadd.f32 %v3205_v16, %v1288_v9  ;;  %2621 = vmatprep.mubr.f32.mxu0 %v1445_v7 }
 0x214   : > { %2622 = vmatmul.mubr.f32.gmra.mrb[70].mxu0 %v1446_v8  ;;  %v1448_v17 = vmax.f32 %v1294_v51, 0.0 }
 0x215   : > { %v1447_v13 = vmax.f32 %v1289_v57, 0.0  ;;  %v2501_v2 = vpop.f32.mrb[74].mxu1 }
 0x216   : > { %v1304_v18 = vadd.f32 %v2501_v2, %v3205_v16  ;;  %v1298_v12 = vpop.f32.mrb[75].mxu1 }
 0x217   : > { %v1299_v19 = vadd.f32 %v3205_v16, %v1298_v12  ;;  %2624 = vmatprep.mubr.f32.mxu0 %v1447_v13 }
 0x218   : > { %2625 = vmatmul.mubr.f32.gmra.mrb[72].mxu0 %v1448_v17  ;;  %v1450_v23 = vmax.f32 %v1304_v18, 0.0 }
 0x219   : > { %v1449_v22 = vmax.f32 %v1299_v19, 0.0  ;;  %v2504_v56 = vpop.f32.mrb[76].mxu1  ;;  %v3271_v19 = vld [vmem:[#allocation2] ss:$0 sm:$0xff] }
 0x21a   : > { %v1314_v28 = vadd.f32 %v2504_v56, %v3205_v16  ;;  %v1308_v4 = vpop.f32.mrb[77].mxu1 }
 0x21b   : > { %v1309_v24 = vadd.f32 %v3205_v16, %v1308_v4  ;;  %2627 = vmatprep.mubr.f32.mxu0 %v1449_v22 }
 0x21c   : > { %2628 = vmatmul.mubr.f32.gmra.mrb[74].mxu0 %v1450_v23  ;;  %v1452_v3 = vmax.f32 %v1314_v28, 0.0 }
 0x21d   : > { %v1451_v27 = vmax.f32 %v1309_v24, 0.0  ;;  %v2507_v15 = vpop.f32.mrb[78].mxu1 }
 0x21e   : > { %v1324_v29 = vadd.f32 %v2507_v15, %v3205_v16  ;;  %v1318_v30 = vpop.f32.mrb[79].mxu1 }
 0x21f   : > { %v1319_v33 = vadd.f32 %v3205_v16, %v1318_v30  ;;  %2630 = vmatprep.mubr.f32.mxu0 %v1451_v27 }
 0x220   : > { %2631 = vmatmul.mubr.f32.gmra.mrb[76].mxu0 %v1452_v3  ;;  %v1454_v14 = vmax.f32 %v1324_v29, 0.0 }
 0x221   : > { %v1453_v26 = vmax.f32 %v1319_v33, 0.0  ;;  %v2510_v34 = vpop.f32.mrb[80].mxu1 }
 0x222   : > { %v1334_v35 = vadd.f32 %v2510_v34, %v3205_v16  ;;  %v1328_v38 = vpop.f32.mrb[81].mxu1 }
 0x223   : > { %v1329_v36 = vadd.f32 %v3205_v16, %v1328_v38  ;;  %2633 = vmatprep.mubr.f32.mxu0 %v1453_v26 }
 0x224   : > { %2634 = vmatmul.mubr.f32.gmra.mrb[78].mxu0 %v1454_v14  ;;  %v1456_v47 = vmax.f32 %v1334_v35, 0.0 }
 0x225   : > { %v1455_v25 = vmax.f32 %v1329_v36, 0.0  ;;  %v2513_v39 = vpop.f32.mrb[82].mxu1 }
 0x226   : > { %v1344_v40 = vadd.f32 %v2513_v39, %v3205_v16  ;;  %v1338_v37 = vpop.f32.mrb[83].mxu1 }
 0x227   : > { %v1339_v43 = vadd.f32 %v3205_v16, %v1338_v37  ;;  %2636 = vmatprep.mubr.f32.mxu0 %v1455_v25 }
 0x228   : > { %2637 = vmatmul.mubr.f32.gmra.mrb[80].mxu0 %v1456_v47  ;;  %v1458_v46 = vmax.f32 %v1344_v40, 0.0 }
 0x229   : > { %v1457_v55 = vmax.f32 %v1339_v43, 0.0  ;;  %v2516_v44 = vpop.f32.mrb[84].mxu1 }
 0x22a   : > { %v1354_v45 = vadd.f32 %v2516_v44, %v3205_v16  ;;  %v1348_v1 = vpop.f32.mrb[85].mxu1 }
 0x22b   : > { %v1349_v48 = vadd.f32 %v3205_v16, %v1348_v1  ;;  %2639 = vmatprep.mubr.f32.mxu0 %v1457_v55 }
 0x22c   : > { %2640 = vmatmul.mubr.f32.gmra.mrb[82].mxu0 %v1458_v46  ;;  %v1460_v11 = vmax.f32 %v1354_v45, 0.0 }
 0x22d   : > { %v1459_v54 = vmax.f32 %v1349_v48, 0.0  ;;  %v2519_v49 = vpop.f32.mrb[86].mxu1 }
 0x22e   : > { %v1364_v50 = vadd.f32 %v2519_v49, %v3205_v16  ;;  %v1358_v0 = vpop.f32.mrb[87].mxu1 }
 0x22f   : > { %v1359_v53 = vadd.f32 %v3205_v16, %v1358_v0  ;;  %2642 = vmatprep.mubr.f32.mxu0 %v1459_v54 }
 0x230   : > { %2643 = vmatmul.mubr.f32.gmra.mrb[84].mxu0 %v1460_v11  ;;  %v1462_v10 = vmax.f32 %v1364_v50, 0.0 }
 0x231   : > { %v1461_v21 = vmax.f32 %v1359_v53, 0.0  ;;  %v2522_v58 = vpop.f32.mrb[88].mxu1 }
 0x232   : > { %v1374_v59 = vadd.f32 %v2522_v58, %v3205_v16  ;;  %v1368_v32 = vpop.f32.mrb[89].mxu1 }
 0x233   : > { %v1369_v60 = vadd.f32 %v3205_v16, %v1368_v32  ;;  %2645 = vmatprep.mubr.f32.mxu0 %v1461_v21 }
 0x234   : > { %2646 = vmatmul.mubr.f32.gmra.mrb[86].mxu0 %v1462_v10  ;;  %v1464_v42 = vmax.f32 %v1374_v59, 0.0 }
 0x235   : > { %v1463_v20 = vmax.f32 %v1369_v60, 0.0  ;;  %v2525_v61 = vpop.f32.mrb[90].mxu1 }
 0x236   : > { %v1384_v62 = vadd.f32 %v2525_v61, %v3205_v16  ;;  %v1378_v31 = vpop.f32.mrb[91].mxu1 }
 0x237   : > { %v1379_v63 = vadd.f32 %v3205_v16, %v1378_v31  ;;  %2648 = vmatprep.mubr.f32.mxu0 %v1463_v20 }
 0x238   : > { %2649 = vmatmul.mubr.f32.gmra.mrb[88].mxu0 %v1464_v42  ;;  %v1466_v41 = vmax.f32 %v1384_v62, 0.0 }
 0x239   : > { %v1465_v52 = vmax.f32 %v1379_v63, 0.0  ;;  %v2528_v6 = vpop.f32.mrb[92].mxu1 }
 0x23a   : > { %v1394_v7 = vadd.f32 %v2528_v6, %v3205_v16  ;;  %v1388_v5 = vpop.f32.mrb[93].mxu1 }
 0x23b   : > { %v1389_v8 = vadd.f32 %v3205_v16, %v1388_v5  ;;  %2651 = vmatprep.mubr.f32.mxu0 %v1465_v52 }
 0x23c   : > { %2652 = vmatmul.mubr.f32.gmra.mrb[90].mxu0 %v1466_v41  ;;  %v1468_v57 = vmax.f32 %v1394_v7, 0.0 }
 0x23d   : > { %v1467_v51 = vmax.f32 %v1389_v8, 0.0  ;;  %v2531_v9 = vpop.f32.mrb[94].mxu1 }
 0x23e   : > { %v1404_v13 = vadd.f32 %v2531_v9, %v3205_v16  ;;  %v1398_v2 = vpop.f32.mrb[95].mxu1 }
 0x23f   : > { %v1399_v17 = vadd.f32 %v3205_v16, %v1398_v2  ;;  %2654 = vmatprep.mubr.f32.mxu0 %v1467_v51 }
 0x240   : > { %2655 = vmatmul.mubr.f32.gmra.mrb[92].mxu0 %v1468_v57  ;;  %v1470_v12 = vmax.f32 %v1404_v13, 0.0 }
 0x241   : > { %v1469_v18 = vmax.f32 %v1399_v17, 0.0 }
 0x243   : > { %2657 = vmatprep.mubr.f32.mxu0 %v1469_v18 }
 0x244   : > { %2658 = vmatmul.mubr.f32.gmra.mrb[94].mxu0 %v1470_v12 }
 0x29b   : > { %v2566_v22 = vpop.f32.mrb[32].mxu0 }
 0x29c   : > { %v1566_v16 = vadd.f32 %v2566_v22, %v3271_v19  ;;  %v1560_v56 = vpop.f32.mrb[33].mxu0 }
 0x29d   : > { %v1561_v23 = vadd.f32 %v3271_v19, %v1560_v56 }
 0x29e   : > { %1881 = vst.msk [vmem:[%s3278_s21 + $0x8] sm:$0xff] %vm1879_vm1, %v1566_v16 }
 0x29f   : > { %1880 = vst.msk [vmem:[%s3278_s21] sm:$0xff] %vm1879_vm1, %v1561_v23  ;;  %v2569_v28 = vpop.f32.mrb[34].mxu0 }
 0x2a0   : > { %v1576_v4 = vadd.f32 %v2569_v28, %v3271_v19  ;;  %v1570_v24 = vpop.f32.mrb[35].mxu0 }
 0x2a1   : > { %v1571_v27 = vadd.f32 %v3271_v19, %v1570_v24 }
 0x2a2   : > { %1883 = vst.msk [vmem:[%s3278_s21 + $0x18] sm:$0xff] %vm1879_vm1, %v1576_v4 }
 0x2a3   : > { %1882 = vst.msk [vmem:[%s3278_s21 + $0x10] sm:$0xff] %vm1879_vm1, %v1571_v27  ;;  %v2572_v15 = vpop.f32.mrb[36].mxu0 }
 0x2a4   : > { %v1586_v3 = vadd.f32 %v2572_v15, %v3271_v19  ;;  %v1580_v29 = vpop.f32.mrb[37].mxu0 }
 0x2a5   : > { %v1581_v30 = vadd.f32 %v3271_v19, %v1580_v29 }
 0x2a6   : > { %1885 = vst.msk [vmem:[%s3278_s21 + $0x28] sm:$0xff] %vm1879_vm1, %v1586_v3 }
 0x2a7   : > { %1884 = vst.msk [vmem:[%s3278_s21 + $0x20] sm:$0xff] %vm1879_vm1, %v1581_v30  ;;  %v2575_v33 = vpop.f32.mrb[38].mxu0 }
 0x2a8   : > { %v1596_v26 = vadd.f32 %v2575_v33, %v3271_v19  ;;  %v1590_v34 = vpop.f32.mrb[39].mxu0 }
 0x2a9   : > { %v1591_v14 = vadd.f32 %v3271_v19, %v1590_v34 }
 0x2aa   : > { %1887 = vst.msk [vmem:[%s3278_s21 + $0x38] sm:$0xff] %vm1879_vm1, %v1596_v26 }
 0x2ab   : > { %1886 = vst.msk [vmem:[%s3278_s21 + $0x30] sm:$0xff] %vm1879_vm1, %v1591_v14  ;;  %v2578_v35 = vpop.f32.mrb[40].mxu0 }
 0x2ac   : > { %v1606_v38 = vadd.f32 %v2578_v35, %v3271_v19  ;;  %v1600_v36 = vpop.f32.mrb[41].mxu0 }
 0x2ad   : > { %v1601_v25 = vadd.f32 %v3271_v19, %v1600_v36 }
 0x2ae   : > { %1889 = vst.msk [vmem:[%s3278_s21 + $0x48] sm:$0xff] %vm1879_vm1, %v1606_v38 }
 0x2af   : > { %1888 = vst.msk [vmem:[%s3278_s21 + $0x40] sm:$0xff] %vm1879_vm1, %v1601_v25  ;;  %v2581_v39 = vpop.f32.mrb[42].mxu0 }
 0x2b0   : > { %v1616_v47 = vadd.f32 %v2581_v39, %v3271_v19  ;;  %v1610_v40 = vpop.f32.mrb[43].mxu0 }
 0x2b1   : > { %v1611_v37 = vadd.f32 %v3271_v19, %v1610_v40 }
 0x2b2   : > { %1891 = vst.msk [vmem:[%s3278_s21 + $0x58] sm:$0xff] %vm1879_vm1, %v1616_v47 }
 0x2b3   : > { %1890 = vst.msk [vmem:[%s3278_s21 + $0x50] sm:$0xff] %vm1879_vm1, %v1611_v37  ;;  %v2584_v43 = vpop.f32.mrb[44].mxu0 }
 0x2b4   : > { %v1626_v55 = vadd.f32 %v2584_v43, %v3271_v19  ;;  %v1620_v44 = vpop.f32.mrb[45].mxu0 }
 0x2b5   : > { %v1621_v46 = vadd.f32 %v3271_v19, %v1620_v44 }
 0x2b6   : > { %1893 = vst.msk [vmem:[%s3278_s21 + $0x68] sm:$0xff] %vm1879_vm1, %v1626_v55 }
 0x2b7   : > { %1892 = vst.msk [vmem:[%s3278_s21 + $0x60] sm:$0xff] %vm1879_vm1, %v1621_v46  ;;  %v2587_v45 = vpop.f32.mrb[46].mxu0 }
 0x2b8   : > { %v1636_v1 = vadd.f32 %v2587_v45, %v3271_v19  ;;  %v1630_v48 = vpop.f32.mrb[47].mxu0 }
 0x2b9   : > { %v1631_v54 = vadd.f32 %v3271_v19, %v1630_v48 }
 0x2ba   : > { %1895 = vst.msk [vmem:[%s3278_s21 + $0x78] sm:$0xff] %vm1879_vm1, %v1636_v1 }
 0x2bb   : > { %1894 = vst.msk [vmem:[%s3278_s21 + $0x70] sm:$0xff] %vm1879_vm1, %v1631_v54  ;;  %v2590_v49 = vpop.f32.mrb[48].mxu0 }
 0x2bc   : > { %v1646_v11 = vadd.f32 %v2590_v49, %v3271_v19  ;;  %v1640_v50 = vpop.f32.mrb[49].mxu0 }
 0x2bd   : > { %v1641_v0 = vadd.f32 %v3271_v19, %v1640_v50 }
 0x2be   : > { %1897 = vst.msk [vmem:[%s3278_s21 + $0x88] sm:$0xff] %vm1879_vm1, %v1646_v11 }
 0x2bf   : > { %1896 = vst.msk [vmem:[%s3278_s21 + $0x80] sm:$0xff] %vm1879_vm1, %v1641_v0  ;;  %v2593_v53 = vpop.f32.mrb[50].mxu0 }
 0x2c0   : > { %v1656_v21 = vadd.f32 %v2593_v53, %v3271_v19  ;;  %v1650_v58 = vpop.f32.mrb[51].mxu0 }
 0x2c1   : > { %v1651_v10 = vadd.f32 %v3271_v19, %v1650_v58 }
 0x2c2   : > { %1899 = vst.msk [vmem:[%s3278_s21 + $0x98] sm:$0xff] %vm1879_vm1, %v1656_v21 }
 0x2c3   : > { %1898 = vst.msk [vmem:[%s3278_s21 + $0x90] sm:$0xff] %vm1879_vm1, %v1651_v10  ;;  %v2596_v59 = vpop.f32.mrb[52].mxu0 }
 0x2c4   : > { %v1666_v32 = vadd.f32 %v2596_v59, %v3271_v19  ;;  %v1660_v60 = vpop.f32.mrb[53].mxu0 }
 0x2c5   : > { %v1661_v20 = vadd.f32 %v3271_v19, %v1660_v60 }
 0x2c6   : > { %1901 = vst.msk [vmem:[%s3278_s21 + $0xa8] sm:$0xff] %vm1879_vm1, %v1666_v32 }
 0x2c7   : > { %1900 = vst.msk [vmem:[%s3278_s21 + $0xa0] sm:$0xff] %vm1879_vm1, %v1661_v20  ;;  %v2599_v61 = vpop.f32.mrb[54].mxu0 }
 0x2c8   : > { %v1676_v42 = vadd.f32 %v2599_v61, %v3271_v19  ;;  %v1670_v62 = vpop.f32.mrb[55].mxu0 }
 0x2c9   : > { %v1671_v31 = vadd.f32 %v3271_v19, %v1670_v62 }
 0x2ca   : > { %1903 = vst.msk [vmem:[%s3278_s21 + $0xb8] sm:$0xff] %vm1879_vm1, %v1676_v42 }
 0x2cb   : > { %1902 = vst.msk [vmem:[%s3278_s21 + $0xb0] sm:$0xff] %vm1879_vm1, %v1671_v31  ;;  %v2602_v63 = vpop.f32.mrb[56].mxu0 }
 0x2cc   : > { %v1686_v52 = vadd.f32 %v2602_v63, %v3271_v19  ;;  %v1680_v6 = vpop.f32.mrb[57].mxu0 }
 0x2cd   : > { %v1681_v41 = vadd.f32 %v3271_v19, %v1680_v6 }
 0x2ce   : > { %1905 = vst.msk [vmem:[%s3278_s21 + $0xc8] sm:$0xff] %vm1879_vm1, %v1686_v52 }
 0x2cf   : > { %1904 = vst.msk [vmem:[%s3278_s21 + $0xc0] sm:$0xff] %vm1879_vm1, %v1681_v41  ;;  %v2605_v7 = vpop.f32.mrb[58].mxu0 }
 0x2d0   : > { %v1696_v5 = vadd.f32 %v2605_v7, %v3271_v19  ;;  %v1690_v8 = vpop.f32.mrb[59].mxu0 }
 0x2d1   : > { %v1691_v51 = vadd.f32 %v3271_v19, %v1690_v8 }
 0x2d2   : > { %1907 = vst.msk [vmem:[%s3278_s21 + $0xd8] sm:$0xff] %vm1879_vm1, %v1696_v5 }
 0x2d3   : > { %1906 = vst.msk [vmem:[%s3278_s21 + $0xd0] sm:$0xff] %vm1879_vm1, %v1691_v51  ;;  %v2608_v9 = vpop.f32.mrb[60].mxu0 }
 0x2d4   : > { %v1706_v57 = vadd.f32 %v2608_v9, %v3271_v19  ;;  %v1700_v13 = vpop.f32.mrb[61].mxu0 }
 0x2d5   : > { %v1701_v2 = vadd.f32 %v3271_v19, %v1700_v13 }
 0x2d6   : > { %1909 = vst.msk [vmem:[%s3278_s21 + $0xe8] sm:$0xff] %vm1879_vm1, %v1706_v57 }
 0x2d7   : > { %1908 = vst.msk [vmem:[%s3278_s21 + $0xe0] sm:$0xff] %vm1879_vm1, %v1701_v2  ;;  %v2611_v17 = vpop.f32.mrb[62].mxu0 }
 0x2d8   : > { %v1716_v18 = vadd.f32 %v2611_v17, %v3271_v19  ;;  %v1710_v12 = vpop.f32.mrb[63].mxu0 }
 0x2d9   : > { %v1711_v22 = vadd.f32 %v3271_v19, %v1710_v12 }
 0x2da   : > { %1911 = vst.msk [vmem:[%s3278_s21 + $0xf8] sm:$0xff] %vm1879_vm1, %v1716_v18 }
 0x2db   : > { %1910 = vst.msk [vmem:[%s3278_s21 + $0xf0] sm:$0xff] %vm1879_vm1, %v1711_v22  ;;  %v2614_v16 = vpop.f32.mrb[64].mxu0 }
 0x2dc   : > { %v1726_v56 = vadd.f32 %v2614_v16, %v3271_v19  ;;  %v1720_v23 = vpop.f32.mrb[65].mxu0 }
 0x2dd   : > { %v1721_v28 = vadd.f32 %v3271_v19, %v1720_v23 }
 0x2de   : > { %1913 = vst.msk [vmem:[%s3278_s21 + $0x108] sm:$0xff] %vm1879_vm1, %v1726_v56 }
 0x2df   : > { %1912 = vst.msk [vmem:[%s3278_s21 + $0x100] sm:$0xff] %vm1879_vm1, %v1721_v28  ;;  %v2617_v4 = vpop.f32.mrb[66].mxu0 }
 0x2e0   : > { %v1736_v24 = vadd.f32 %v2617_v4, %v3271_v19  ;;  %v1730_v27 = vpop.f32.mrb[67].mxu0 }
 0x2e1   : > { %v1731_v15 = vadd.f32 %v3271_v19, %v1730_v27 }
 0x2e2   : > { %1915 = vst.msk [vmem:[%s3278_s21 + $0x118] sm:$0xff] %vm1879_vm1, %v1736_v24 }
 0x2e3   : > { %1914 = vst.msk [vmem:[%s3278_s21 + $0x110] sm:$0xff] %vm1879_vm1, %v1731_v15  ;;  %v2620_v3 = vpop.f32.mrb[68].mxu0 }
 0x2e4   : > { %v1746_v29 = vadd.f32 %v2620_v3, %v3271_v19  ;;  %v1740_v30 = vpop.f32.mrb[69].mxu0 }
 0x2e5   : > { %v1741_v33 = vadd.f32 %v3271_v19, %v1740_v30 }
 0x2e6   : > { %1917 = vst.msk [vmem:[%s3278_s21 + $0x128] sm:$0xff] %vm1879_vm1, %v1746_v29 }
 0x2e7   : > { %1916 = vst.msk [vmem:[%s3278_s21 + $0x120] sm:$0xff] %vm1879_vm1, %v1741_v33  ;;  %v2623_v26 = vpop.f32.mrb[70].mxu0 }
 0x2e8   : > { %v1756_v34 = vadd.f32 %v2623_v26, %v3271_v19  ;;  %v1750_v14 = vpop.f32.mrb[71].mxu0 }
 0x2e9   : > { %v1751_v35 = vadd.f32 %v3271_v19, %v1750_v14 }
 0x2ea   : > { %1919 = vst.msk [vmem:[%s3278_s21 + $0x138] sm:$0xff] %vm1879_vm1, %v1756_v34 }
 0x2eb   : > { %1918 = vst.msk [vmem:[%s3278_s21 + $0x130] sm:$0xff] %vm1879_vm1, %v1751_v35  ;;  %v2626_v38 = vpop.f32.mrb[72].mxu0 }
 0x2ec   : > { %v1766_v36 = vadd.f32 %v2626_v38, %v3271_v19  ;;  %v1760_v25 = vpop.f32.mrb[73].mxu0 }
 0x2ed   : > { %v1761_v39 = vadd.f32 %v3271_v19, %v1760_v25 }
 0x2ee   : > { %1921 = vst.msk [vmem:[%s3278_s21 + $0x148] sm:$0xff] %vm1879_vm1, %v1766_v36 }
 0x2ef   : > { %1920 = vst.msk [vmem:[%s3278_s21 + $0x140] sm:$0xff] %vm1879_vm1, %v1761_v39  ;;  %v2629_v47 = vpop.f32.mrb[74].mxu0 }
 0x2f0   : > { %v1776_v40 = vadd.f32 %v2629_v47, %v3271_v19  ;;  %v1770_v37 = vpop.f32.mrb[75].mxu0 }
 0x2f1   : > { %v1771_v43 = vadd.f32 %v3271_v19, %v1770_v37 }
 0x2f2   : > { %1923 = vst.msk [vmem:[%s3278_s21 + $0x158] sm:$0xff] %vm1879_vm1, %v1776_v40 }
 0x2f3   : > { %1922 = vst.msk [vmem:[%s3278_s21 + $0x150] sm:$0xff] %vm1879_vm1, %v1771_v43  ;;  %v2632_v55 = vpop.f32.mrb[76].mxu0 }
 0x2f4   : > { %v1786_v44 = vadd.f32 %v2632_v55, %v3271_v19  ;;  %v1780_v46 = vpop.f32.mrb[77].mxu0 }
 0x2f5   : > { %v1781_v45 = vadd.f32 %v3271_v19, %v1780_v46 }
 0x2f6   : > { %1925 = vst.msk [vmem:[%s3278_s21 + $0x168] sm:$0xff] %vm1879_vm1, %v1786_v44 }
 0x2f7   : > { %1924 = vst.msk [vmem:[%s3278_s21 + $0x160] sm:$0xff] %vm1879_vm1, %v1781_v45  ;;  %v2635_v1 = vpop.f32.mrb[78].mxu0 }
 0x2f8   : > { %v1796_v48 = vadd.f32 %v2635_v1, %v3271_v19  ;;  %v1790_v54 = vpop.f32.mrb[79].mxu0 }
 0x2f9   : > { %v1791_v49 = vadd.f32 %v3271_v19, %v1790_v54 }
 0x2fa   : > { %1927 = vst.msk [vmem:[%s3278_s21 + $0x178] sm:$0xff] %vm1879_vm1, %v1796_v48 }
 0x2fb   : > { %1926 = vst.msk [vmem:[%s3278_s21 + $0x170] sm:$0xff] %vm1879_vm1, %v1791_v49  ;;  %v2638_v11 = vpop.f32.mrb[80].mxu0 }
 0x2fc   : > { %v1806_v50 = vadd.f32 %v2638_v11, %v3271_v19  ;;  %v1800_v0 = vpop.f32.mrb[81].mxu0 }
 0x2fd   : > { %v1801_v53 = vadd.f32 %v3271_v19, %v1800_v0 }
 0x2fe   : > { %1929 = vst.msk [vmem:[%s3278_s21 + $0x188] sm:$0xff] %vm1879_vm1, %v1806_v50 }
 0x2ff   : > { %1928 = vst.msk [vmem:[%s3278_s21 + $0x180] sm:$0xff] %vm1879_vm1, %v1801_v53  ;;  %v2641_v21 = vpop.f32.mrb[82].mxu0 }
 0x300   : > { %v1816_v58 = vadd.f32 %v2641_v21, %v3271_v19  ;;  %v1810_v10 = vpop.f32.mrb[83].mxu0 }
 0x301   : > { %v1811_v59 = vadd.f32 %v3271_v19, %v1810_v10 }
 0x302   : > { %1931 = vst.msk [vmem:[%s3278_s21 + $0x198] sm:$0xff] %vm1879_vm1, %v1816_v58 }
 0x303   : > { %1930 = vst.msk [vmem:[%s3278_s21 + $0x190] sm:$0xff] %vm1879_vm1, %v1811_v59  ;;  %v2644_v32 = vpop.f32.mrb[84].mxu0 }
 0x304   : > { %v1826_v60 = vadd.f32 %v2644_v32, %v3271_v19  ;;  %v1820_v20 = vpop.f32.mrb[85].mxu0 }
 0x305   : > { %v1821_v61 = vadd.f32 %v3271_v19, %v1820_v20 }
 0x306   : > { %1933 = vst.msk [vmem:[%s3278_s21 + $0x1a8] sm:$0xff] %vm1879_vm1, %v1826_v60 }
 0x307   : > { %1932 = vst.msk [vmem:[%s3278_s21 + $0x1a0] sm:$0xff] %vm1879_vm1, %v1821_v61  ;;  %v2647_v42 = vpop.f32.mrb[86].mxu0 }
 0x308   : > { %v1836_v62 = vadd.f32 %v2647_v42, %v3271_v19  ;;  %v1830_v31 = vpop.f32.mrb[87].mxu0 }
 0x309   : > { %v1831_v63 = vadd.f32 %v3271_v19, %v1830_v31 }
 0x30a   : > { %1935 = vst.msk [vmem:[%s3278_s21 + $0x1b8] sm:$0xff] %vm1879_vm1, %v1836_v62 }
 0x30b   : > { %1934 = vst.msk [vmem:[%s3278_s21 + $0x1b0] sm:$0xff] %vm1879_vm1, %v1831_v63  ;;  %v2650_v52 = vpop.f32.mrb[88].mxu0 }
 0x30c   : > { %v1846_v6 = vadd.f32 %v2650_v52, %v3271_v19  ;;  %v1840_v41 = vpop.f32.mrb[89].mxu0 }
 0x30d   : > { %v1841_v7 = vadd.f32 %v3271_v19, %v1840_v41 }
 0x30e   : > { %1937 = vst.msk [vmem:[%s3278_s21 + $0x1c8] sm:$0xff] %vm1879_vm1, %v1846_v6 }
 0x30f   : > { %1936 = vst.msk [vmem:[%s3278_s21 + $0x1c0] sm:$0xff] %vm1879_vm1, %v1841_v7  ;;  %v2653_v5 = vpop.f32.mrb[90].mxu0 }
 0x310   : > { %v1856_v8 = vadd.f32 %v2653_v5, %v3271_v19  ;;  %v1850_v51 = vpop.f32.mrb[91].mxu0 }
 0x311   : > { %v1851_v9 = vadd.f32 %v3271_v19, %v1850_v51 }
 0x312   : > { %1939 = vst.msk [vmem:[%s3278_s21 + $0x1d8] sm:$0xff] %vm1879_vm1, %v1856_v8 }
 0x313   : > { %1938 = vst.msk [vmem:[%s3278_s21 + $0x1d0] sm:$0xff] %vm1879_vm1, %v1851_v9  ;;  %v2656_v57 = vpop.f32.mrb[92].mxu0 }
 0x314   : > { %v1866_v13 = vadd.f32 %v2656_v57, %v3271_v19  ;;  %v1860_v2 = vpop.f32.mrb[93].mxu0 }
 0x315   : > { %v1861_v17 = vadd.f32 %v3271_v19, %v1860_v2 }
 0x316   : > { %1941 = vst.msk [vmem:[%s3278_s21 + $0x1e8] sm:$0xff] %vm1879_vm1, %v1866_v13 }
 0x317   : > { %1940 = vst.msk [vmem:[%s3278_s21 + $0x1e0] sm:$0xff] %vm1879_vm1, %v1861_v17  ;;  %v2659_v18 = vpop.f32.mrb[94].mxu0 }
 0x318   : > { %v1876_v12 = vadd.f32 %v2659_v18, %v3271_v19  ;;  %v1870_v22 = vpop.f32.mrb[95].mxu0 }
 0x319   : > { %v1871_v16 = vadd.f32 %v3271_v19, %v1870_v22 }
 0x31a   : > { %1943 = vst.msk [vmem:[%s3278_s21 + $0x1f8] sm:$0xff] %vm1879_vm1, %v1876_v12 }
 0x31b   : > { %1942 = vst.msk [vmem:[%s3278_s21 + $0x1f0] sm:$0xff] %vm1879_vm1, %v1871_v16 }
 0x31c PF: > { %s19_s26 = sadd.s32 1, %s2744_s26  }
 0x31d   : > { %p16_p4 = scmp.ge.s32.totalorder %s19_s26, 4  }
 0x31f   :  { %18 = sbr.rel (!%p16_p4) target bundleno = 3 (0x3), region = 78 }

</bundles_post_ra>
